<compile_context>
chip_gen: v7x
topology: tpu7x:2x2x1
jax: 0.10.0
libtpu: 0.0.40
codegen_flags: <defaults>
</compile_context>

<pallas_src>
import functools

import jax
import jax.numpy as jnp
from jax.experimental import pallas as pl
from jax.experimental.pallas import tpu as pltpu

LANE = 128


def memb_fused_kernel(key_ref, keys_ref, values_ref, out_ref, att_ref, *, tile_r):
    j = pl.program_id(0)

    # Step 0: attention softmax over the S memory slots, computed once and kept
    # resident in the (S, 1) VMEM scratch for all later tiles.
    @pl.when(j == 0)
    def _():
        key_row = key_ref[...]                                      # (1, K) resident
        keys = keys_ref[...]                                        # (S, K) resident
        logits = jnp.sum(keys * key_row, axis=-1, keepdims=True)    # (S, 1)
        logits = logits - jnp.max(logits, axis=0, keepdims=True)
        e = jnp.exp(logits)
        att_ref[...] = e / jnp.sum(e, axis=0, keepdims=True)

    # Weighted sum over slots for this O tile -> dense (tile_r, 128) slab written
    # into the resident full-O output block (torch: sum(values * attention, dim=0)).
    att = att_ref[...].reshape(att_ref.shape[0], 1, 1)               # (S, 1, 1)
    vals = values_ref[...]                                           # (S, tile_r, 128)
    wsum = jnp.sum(vals * att, axis=0)                               # (tile_r, 128)
    row0 = pl.multiple_of(j * tile_r, tile_r)
    out_ref[pl.ds(row0, tile_r), :] = wsum.astype(out_ref.dtype)

    # Last step: softmax over the entire output dimension, in place on the
    # resident (O//128, 128) block.
    @pl.when(j == pl.num_programs(0) - 1)
    def _():
        v = out_ref[...]                                             # (R, 128)
        m = jnp.max(v, axis=-1, keepdims=True)
        m = jnp.max(m, axis=0, keepdims=True)                        # global max
        e = jnp.exp(v - m)
        s = jnp.sum(e, axis=-1, keepdims=True)
        s = jnp.sum(s, axis=0, keepdims=True)                        # global sum
        out_ref[...] = (e / s).astype(out_ref.dtype)


def memb_forward(x, keys, values, *, tile_o=16384):
    """x: any shape with numel == K; keys: (S, K); values: (S, O) with O == 3*128*128."""
    S, K = keys.shape
    O = values.shape[1]
    assert x.size == K, f"x.numel()={x.size} must equal keysize={K}"
    assert O == 3 * 128 * 128, "outputsize must be 3*128*128 for the final reshape"
    assert O % tile_o == 0 and tile_o % LANE == 0

    R = O // LANE                       # 384 output rows (sublane-dense view)
    tile_r = tile_o // LANE             # 128 rows per grid step
    num_tiles = O // tile_o             # 3 grid steps

    # torch flatten order == row-major reshape; lane-dense key row.
    key_row = x.reshape(1, K).astype(jnp.float32)
    # Free contiguous re-view: (S, O) -> (S, O//128, 128) for dense reduce/store.
    values3d = values.reshape(S, R, LANE)

    cost = pl.CostEstimate(
        flops=2 * S * K + 2 * S * O + 3 * O,
        transcendentals=O + S,
        bytes_accessed=4 * (K + S * K + S * O + O),
    )

    kernel = functools.partial(memb_fused_kernel, tile_r=tile_r)

    out2d = pl.pallas_call(
        kernel,
        out_shape=jax.ShapeDtypeStruct((R, LANE), jnp.float32),
        grid=(num_tiles,),
        in_specs=[
            pl.BlockSpec((1, K), lambda j: (0, 0)),            # key: resident
            pl.BlockSpec((S, K), lambda j: (0, 0)),            # keys: resident
            pl.BlockSpec((S, tile_r, LANE), lambda j: (0, j, 0)),  # values: streamed
        ],
        # Constant index_map: the full (R, 128) output block stays resident across
        # all grid steps and is written back to HBM once, after the final softmax.
        out_specs=pl.BlockSpec((R, LANE), lambda j: (0, 0)),
        scratch_shapes=[pltpu.VMEM((S, 1), jnp.float32)],      # resident attention
        compiler_params=pltpu.CompilerParams(
            dimension_semantics=("arbitrary",),                # resident output block
        ),
        cost_estimate=cost,
    )(key_row, keys, values3d)

    return out2d.reshape(1, 3, 128, 128)


def memb_reference(x, keys, values):
    key = x.reshape(-1).astype(jnp.float32)
    att = jax.nn.softmax(keys @ key, axis=0)
    value = jnp.sum(values * att[:, None], axis=0)
    value = jax.nn.softmax(value, axis=0)
    return value.reshape(1, 3, 128, 128)


if __name__ == "__main__":
    # Small deterministic setup consistent with the module:
    #   x: (2, 4, 16, 16) NCHW  -> keysize = 2048
    #   size = 8 memory slots
    #   outputsize = 3*128*128 = 49152 (required by the hard-coded reshape)
    size = 8
    keysize = 2 * 4 * 16 * 16
    outputsize = 3 * 128 * 128

    root = jax.random.PRNGKey(0)
    k_x, k_keys, k_vals = jax.random.split(root, 3)

    x = jax.random.normal(k_x, (2, 4, 16, 16), dtype=jnp.float32)
    keys = jax.random.normal(k_keys, (size, keysize), dtype=jnp.float32)
    values = jax.random.normal(k_vals, (size, outputsize), dtype=jnp.float32)

    out = memb_forward(x, keys, values)
    out = jax.block_until_ready(out)

    assert out.shape == (1, 3, 128, 128)
    assert jnp.isfinite(out).all()

    ref = memb_reference(x, keys, values)
    assert jnp.allclose(out, ref, rtol=1e-3, atol=1e-6), "mismatch vs JAX reference"

    print("KERNEL_OK")
</pallas_src>

<mosaic_0001>
module attributes {stable_mosaic.version = 11 : i64} {
  func.func @memb_fused_kernel(%arg0: i32, %arg1: memref<1x2048xf32, #tpu.memory_space<vmem>>, %arg2: memref<8x2048xf32, #tpu.memory_space<vmem>>, %arg3: memref<8x128x128xf32, #tpu.memory_space<vmem>>, %arg4: memref<384x128xf32, #tpu.memory_space<vmem>>, %arg5: memref<8x1xf32, #tpu.memory_space<vmem>>) attributes {dimension_semantics = [#tpu.dimension_semantics<arbitrary>], iteration_bounds = array<i64: 3>, scalar_prefetch = 0 : i64, scratch_operands = 1 : i64, tpu.core_type = #tpu.core_type<tc>, window_params = [{pipeline_mode = #tpu.pipeline_mode<synchronous>, transform_indices = @transform_0, window_bounds = array<i64: 1, 2048>}, {pipeline_mode = #tpu.pipeline_mode<synchronous>, transform_indices = @transform_1, window_bounds = array<i64: 8, 2048>}, {transform_indices = @transform_2, window_bounds = array<i64: 8, 128, 128>}, {pipeline_mode = #tpu.pipeline_mode<synchronous>, transform_indices = @transform_3, window_bounds = array<i64: 384, 128>}]} {
    %c0_i32 = arith.constant 0 : i32
    %0 = arith.cmpi eq, %arg0, %c0_i32 : i32
    %1 = arith.extui %0 : i1 to i32
    %c0_i32_0 = arith.constant 0 : i32
    %2 = arith.cmpi ne, %1, %c0_i32_0 : i32
    scf.if %2 {
      %c0_7 = arith.constant 0 : index
      %c0_8 = arith.constant 0 : index
      %16 = vector.load %arg1[%c0_7, %c0_8] : memref<1x2048xf32, #tpu.memory_space<vmem>>, vector<1x2048xf32>
      %c0_9 = arith.constant 0 : index
      %c0_10 = arith.constant 0 : index
      %17 = vector.load %arg2[%c0_9, %c0_10] : memref<8x2048xf32, #tpu.memory_space<vmem>>, vector<8x2048xf32>
      %18 = vector.broadcast %16 : vector<1x2048xf32> to vector<8x2048xf32>
      %19 = arith.mulf %17, %18 : vector<8x2048xf32>
      %cst_11 = arith.constant dense<0.000000e+00> : vector<8xf32>
      %20 = vector.multi_reduction <add>, %19, %cst_11 [1] : vector<8x2048xf32> to vector<8xf32>
      %21 = vector.shape_cast %20 : vector<8xf32> to vector<8x1xf32>
      %cst_12 = arith.constant dense<0xFF800000> : vector<1xf32>
      %22 = vector.multi_reduction <maximumf>, %21, %cst_12 [0] : vector<8x1xf32> to vector<1xf32>
      %23 = vector.shape_cast %22 : vector<1xf32> to vector<1x1xf32>
      %24 = vector.broadcast %23 : vector<1x1xf32> to vector<8x1xf32>
      %25 = arith.subf %21, %24 : vector<8x1xf32>
      %26 = math.exp %25 : vector<8x1xf32>
      %cst_13 = arith.constant dense<0.000000e+00> : vector<1xf32>
      %27 = vector.multi_reduction <add>, %26, %cst_13 [0] : vector<8x1xf32> to vector<1xf32>
      %28 = vector.shape_cast %27 : vector<1xf32> to vector<1x1xf32>
      %29 = vector.broadcast %28 : vector<1x1xf32> to vector<8x1xf32>
      %30 = arith.divf %26, %29 : vector<8x1xf32>
      %c0_14 = arith.constant 0 : index
      %c0_15 = arith.constant 0 : index
      %31 = vector.load %arg5[%c0_14, %c0_15] : memref<8x1xf32, #tpu.memory_space<vmem>>, vector<8x1xf32>
      tpu.vector_store %arg5[%c0_14, %c0_15], %30 {strides = array<i32>} : memref<8x1xf32, #tpu.memory_space<vmem>>, vector<8x1xf32>,
    } else {
    }
    %c0 = arith.constant 0 : index
    %c0_1 = arith.constant 0 : index
    %3 = vector.load %arg5[%c0, %c0_1] : memref<8x1xf32, #tpu.memory_space<vmem>>, vector<8x1xf32>
    %4 = vector.shape_cast %3 : vector<8x1xf32> to vector<8x1x1xf32>
    %c0_2 = arith.constant 0 : index
    %c0_3 = arith.constant 0 : index
    %c0_4 = arith.constant 0 : index
    %5 = vector.load %arg3[%c0_2, %c0_3, %c0_4] : memref<8x128x128xf32, #tpu.memory_space<vmem>>, vector<8x128x128xf32>
    %6 = vector.broadcast %4 : vector<8x1x1xf32> to vector<8x128x128xf32>
    %7 = arith.mulf %5, %6 : vector<8x128x128xf32>
    %cst = arith.constant dense<0.000000e+00> : vector<128x128xf32>
    %8 = vector.multi_reduction <add>, %7, %cst [0] : vector<8x128x128xf32> to vector<128x128xf32>
    %c128_i32 = arith.constant 128 : i32
    %9 = arith.muli %arg0, %c128_i32 : i32
    %10 = tpu.assume_multiple %9, 128 : i32
    %11 = arith.index_cast %10 : i32 to index
    %c0_5 = arith.constant 0 : index
    %12 = vector.load %arg4[%11, %c0_5] : memref<384x128xf32, #tpu.memory_space<vmem>>, vector<128x128xf32>
    tpu.vector_store %arg4[%11, %c0_5], %8 {strides = array<i32>} : memref<384x128xf32, #tpu.memory_space<vmem>>, vector<128x128xf32>,
    %c2_i32 = arith.constant 2 : i32
    %13 = arith.cmpi eq, %arg0, %c2_i32 : i32
    %14 = arith.extui %13 : i1 to i32
    %c0_i32_6 = arith.constant 0 : i32
    %15 = arith.cmpi ne, %14, %c0_i32_6 : i32
    scf.if %15 {
      %c0_7 = arith.constant 0 : index
      %c0_8 = arith.constant 0 : index
      %16 = vector.load %arg4[%c0_7, %c0_8] : memref<384x128xf32, #tpu.memory_space<vmem>>, vector<384x128xf32>
      %cst_9 = arith.constant dense<0xFF800000> : vector<384xf32>
      %17 = vector.multi_reduction <maximumf>, %16, %cst_9 [1] : vector<384x128xf32> to vector<384xf32>
      %18 = vector.shape_cast %17 : vector<384xf32> to vector<384x1xf32>
      %cst_10 = arith.constant dense<0xFF800000> : vector<1xf32>
      %19 = vector.multi_reduction <maximumf>, %18, %cst_10 [0] : vector<384x1xf32> to vector<1xf32>
      %20 = vector.shape_cast %19 : vector<1xf32> to vector<1x1xf32>
      %21 = vector.broadcast %20 : vector<1x1xf32> to vector<384x128xf32>
      %22 = arith.subf %16, %21 : vector<384x128xf32>
      %23 = math.exp %22 : vector<384x128xf32>
      %cst_11 = arith.constant dense<0.000000e+00> : vector<384xf32>
      %24 = vector.multi_reduction <add>, %23, %cst_11 [1] : vector<384x128xf32> to vector<384xf32>
      %25 = vector.shape_cast %24 : vector<384xf32> to vector<384x1xf32>
      %cst_12 = arith.constant dense<0.000000e+00> : vector<1xf32>
      %26 = vector.multi_reduction <add>, %25, %cst_12 [0] : vector<384x1xf32> to vector<1xf32>
      %27 = vector.shape_cast %26 : vector<1xf32> to vector<1x1xf32>
      %28 = vector.broadcast %27 : vector<1x1xf32> to vector<384x128xf32>
      %29 = arith.divf %23, %28 : vector<384x128xf32>
      %c0_13 = arith.constant 0 : index
      %c0_14 = arith.constant 0 : index
      %30 = vector.load %arg4[%c0_13, %c0_14] : memref<384x128xf32, #tpu.memory_space<vmem>>, vector<384x128xf32>
      tpu.vector_store %arg4[%c0_13, %c0_14], %29 {strides = array<i32>} : memref<384x128xf32, #tpu.memory_space<vmem>>, vector<384x128xf32>,
    } else {
    }
    return
  }
  func.func @transform_0(%arg0: i32) -> (i32, i32) {
    %c0_i32 = arith.constant 0 : i32
    %c0_i32_0 = arith.constant 0 : i32
    %c0_i32_1 = arith.constant 0 : i32
    return %c0_i32, %c0_i32_0 : i32, i32
  }
  func.func @transform_1(%arg0: i32) -> (i32, i32) {
    %c0_i32 = arith.constant 0 : i32
    %c0_i32_0 = arith.constant 0 : i32
    %c0_i32_1 = arith.constant 0 : i32
    return %c0_i32, %c0_i32_0 : i32, i32
  }
  func.func @transform_2(%arg0: i32) -> (i32, i32, i32) {
    %c0_i32 = arith.constant 0 : i32
    %c0_i32_0 = arith.constant 0 : i32
    %c0_i32_1 = arith.constant 0 : i32
    return %c0_i32, %arg0, %c0_i32_0 : i32, i32, i32
  }
  func.func @transform_3(%arg0: i32) -> (i32, i32) {
    %c0_i32 = arith.constant 0 : i32
    %c0_i32_0 = arith.constant 0 : i32
    %c0_i32_1 = arith.constant 0 : i32
    return %c0_i32, %c0_i32_0 : i32, i32
  }
}

</mosaic_0001>

<bundles_post_ra>
// kernel: tpu_custom_call.1
= control target key start
LH: loop header
LB: loop body
LE: loop exit
PB: predicated region body
PF: predicated region fallthrough
CT: control target
= control target key end

     0   :  { %8 = vsyncpa [#allocation4], 0  ;;  %s2975_s0 = inlined_call_operand.hbm [shape: f32[1,2048], index: 0, kind: input, shape index: {}]   ;;  %s2976_s1 = inlined_call_operand.hbm [shape: f32[8,2048], index: 1, kind: input, shape index: {}]   ;;  %s2977_s2 = inlined_call_operand.hbm [shape: f32[8,384,128], index: 2, kind: input, shape index: {}]   ;;  %s2978_s3 = inlined_call_operand.hbm [shape: f32[384,128], index: 3, kind: output, shape index: {}]  }
   0x1   :  { %9 = vsyncpa [#allocation7], 0 }
   0x2   :  { %10 = vsyncpa [#allocation5], 0  ;;  %s1923_s12 = smov 0   ;;  %s1925_s13 = smov 0  }
   0x3   :  { %s1927_s14 = smov 0   ;;  %s1929_s15 = smov 0  }
   0x4 LB: > { %s1942_s16 = sadd.s32 4294967295, %s1888_s15   ;;  %s1945_s17 = sadd.s32 1, %s1888_s15   ;;  %s1888_s15 = sphi %s1929_s15, %s3169_s15   ;;  %s1884_s14 = sphi %s1927_s14, %s3168_s14   ;;  %s1880_s13 = sphi %s1925_s13, %s3167_s13   ;;  %s1876_s12 = sphi %s1923_s12, %s3166_s12  }
   0x5   : > { %s62_s18 = ssub.s32 %s1888_s15, %s1945_s17  ;;  %s65_s19 = sadd.s32 1, %s1884_s14 }
   0x6   : > { %p63_p0 = scmp.eq.s32.totalorder %s62_s18, 0  ;;  %p72_p1 = scmp.ne.s32.totalorder %s1884_s14, %s1880_s13 }
   0x7   : > { %p73_p2 = scmp.eq.s32.totalorder %s1888_s15, 0  ;;  %p78_p3 = scmp.ne.s32.totalorder %s1880_s13, %s1876_s12 }
   0x8   : > { %s1955_s20 = scalar_select %p63_p0, %s1884_s14, %s65_s19  }
   0x9   : > { %p1957_p4 = por %p73_p2, %p72_p1  ;;  %p2979_p5 = scmp.eq.s32.totalorder %s1942_s16, 0 }
   0xa   : > { %p1555_p6 = scmp.ge.s32.totalorder %s1888_s15, 1  ;;  %p110_p7 = scmp.lt.s32.totalorder %s1888_s15, 4 }
   0xb   : > { %s3028_s21 = scalar_select %p1957_p4, 1, 0 }
   0xc   : > { %p1966_p8 = por %p2979_p5, %p78_p3  ;;  %p1971_p10 = pnand %p1555_p6, %p110_p7 }
   0xd   : > { %s1890_s24 = smov [#allocation3]   ;;  %s1891_s26 = smov [#allocation6]  }
   0xe   : > { %s3029_s22 = scalar_select %p1966_p8, 1, 0 }
   0xf   : > { %s3030_s23 = scalar_select %p1971_p10, 1, 0 }
  0x10   : > { %s123_s25 = sshll.u32 %s1890_s24, 4  ;;  %p1597_p11 = pneg %p1971_p10  ;;  %s124_s25 = int_to_ptr.vmem [resolvable:$true] %s123_s25 }
  0x11   : > { %s134_s27 = sshll.u32 %s1891_s26, 4  ;;  %s1760_s4 = scalar_lea.hbm %s2975_s0, 256  ;;  %s1983_s27 = int_to_ptr.vmem [resolvable:$true] %s134_s27 }
  0x12   : > { %p1979_p12 = pnand %p1597_p11, %p2979_p5  ;;  %p1761_p13 = scmp.ne.s32.totalorder %s2975_s0, %s1760_s4 }
  0x13   : > { %p1767_p3 = scmp.lt.u32.totalorder %s1760_s4, %s2975_s0 }
  0x14   : > { %p1762_p0 = pneg %p1979_p12 }
  0x16   : > { %p1763_p1 = pnand %p1762_p0, %p1761_p13 }
  0x18   : > { %p1764_p2 = pneg %p1763_p1 }
  0x1a   : > { %p1769_p6 = pnand %p1767_p3, %p1764_p2 }
  0x1c   : > { %1772 = shalt.err (!%p1769_p6)
}
  0x1d   : > { %s1773_s9 = scalar_lea.vmem %s124_s25, 256  ;;  %p1781_p5 = scmp.lt.s32.totalorder %s124_s25, %s124_s25 }
  0x1e   : > { %p1774_p7 = scmp.ne.s32.totalorder %s124_s25, %s1773_s9  ;;  %p1782_p8 = scmp.lt.s32.totalorder %s1773_s9, %s1773_s9 }
  0x20   : > { %p1776_p11 = pnand %p1774_p7, %p1762_p0  ;;  %p1783_p10 = por %p1782_p8, %p1781_p5 }
  0x22   : > { %p1777_p9 = pneg %p1776_p11 }
  0x24   : > { %p1784_p4 = pnand %p1783_p10, %p1777_p9 }
  0x26   : > { %1787 = shalt.err (!%p1784_p4)
}
  0x27   : > { %1600 = dma.hbm_to_vmem [thread:$0]  (!%p1979_p12), %s2975_s0, 256, %s124_s25, [#allocation4]  }
  0x28   : > { %s1788_s19 = scalar_lea.hbm %s2976_s1, 2048 }
  0x29   : > { %p1789_p13 = scmp.ne.s32.totalorder %s2976_s1, %s1788_s19  ;;  %p1795_p4 = scmp.lt.u32.totalorder %s1788_s19, %s2976_s1 }
  0x2b   : > { %p1791_p5 = pnand %p1789_p13, %p1762_p0 }
  0x2d   : > { %p1792_p8 = pneg %p1791_p5 }
  0x2f   : > { %p1797_p9 = pnand %p1795_p4, %p1792_p8 }
  0x31   : > { %1800 = shalt.err (!%p1797_p9)
}
  0x32   : > { %s1801_s25 = scalar_lea.vmem %s1983_s27, 2048  ;;  %p1809_p3 = scmp.lt.s32.totalorder %s1983_s27, %s1983_s27 }
  0x33   : > { %p1802_p10 = scmp.ne.s32.totalorder %s1983_s27, %s1801_s25  ;;  %p1810_p6 = scmp.lt.s32.totalorder %s1801_s25, %s1801_s25 }
  0x35   : > { %p1804_p1 = pnand %p1802_p10, %p1762_p0  ;;  %p1811_p7 = por %p1810_p6, %p1809_p3 }
  0x37   : > { %p1805_p2 = pneg %p1804_p1 }
  0x39   : > { %p1812_p11 = pnand %p1811_p7, %p1805_p2 }
  0x3b   : > { %1815 = shalt.err (!%p1812_p11)
}
  0x3c   : > { %1603 = dma.hbm_to_vmem [thread:$0]  (!%p1979_p12), %s2976_s1, 2048, %s1983_s27, [#allocation7]  }
  0x3d   : > { %p1558_p13 = scmp.ge.s32.totalorder %s1888_s15, 3 }
  0x3f   : > { %141 = sbr.rel (%p1558_p13) target bundleno = 85 (0x55), region = 24 }
  0x46   : > { %s145_s6 = sand.u32 1, %s1888_s15   ;;  %s147_s7 = sand.u32 1, %s1884_s14  }
  0x47   : > { %s1559_s8 = sshll.u32 %s147_s7, 10  ;;  %s1575_s28 = sshll.u32 %s1888_s15, 11 }
  0x48   : > { %s155_s27 = scalar_lea.hbm %s2977_s2, %s1575_s28  ;;  %p3032_p12 = scmp.ne.s32.totalorder %s3028_s21, 0 }
  0x49   : > { %s149_s12 = scalar_lea.vmem [#allocation8], %s1559_s8  ;;  %s1892_s24 = smov 6144  }
  0x4a   : > { %s1580_s11 = scalar_select %p3032_p12, [#allocation0], [#allocation12] }
  0x4b   : > { %s168_s18 = sshll.u32 %s149_s12, 4  ;;  %1581 = sst [smem:[#allocation11]] (%p3032_p12), %s1892_s24  ;;  %s169_s18 = int_to_ptr.vmem [resolvable:$true] %s168_s18 }
  0x4c   : > { %s160_s19 = sld [smem:[%s1580_s11]]   ;;  %s1893_s26 = smov 2048  }
  0x4d   : > { %1582 = sst [smem:[#allocation11 + $0x1]] (%p3032_p12), %s1893_s26  ;;  %s1894_s29 = smov 16  }
  0x4e   : > { %1583 = sst [smem:[#allocation11 + $0x2]] (%p3032_p12), %s1894_s29  ;;  %s1895_s15 = smov 128  }
  0x4f   : > { %1584 = sst [smem:[#allocation11 + $0x3]] (%p3032_p12), %s1895_s15  ;;  %s1896_s25 = smov 8  }
  0x50   : > { %1585 = sst [smem:[#allocation11 + $0x4]] (%p3032_p12), %s1895_s15  ;;  %s146_s5 = scalar_lea.sflag [#allocation4], %s145_s6 }
  0x51   : > { %1586 = sst [smem:[#allocation11 + $0x5]] (%p3032_p12), %s1896_s25  ;;  %s1897_s7 = smov [#allocation10]  }
  0x52   : > { %s1562_s30 = sshll.u32 %s160_s19, 26 }
  0x53   : > { %s1563_s4 = sadd.s32 134217728, %s1562_s30 }
  0x54   : > { %1587 = dma.general (%p3032_p12), %s155_s27, 16384, %s169_s18, %s146_s5, %s1897_s7, [#allocation11], %s1563_s4, 0  }
  0x55 PF: > { %p3033_p0 = scmp.ne.s32.totalorder %s3030_s23, 0 }
  0x57   : > { %193 = sbr.rel (%p3033_p0) target bundleno = 1140 (0x474), region = 32 }
  0x5e   : > { %p3034_p5 = scmp.eq.s32.totalorder %s1942_s16, 0 }
  0x60   : > { %1859 = dma.done.wait (%p3034_p5), [#allocation4], 256   ;;  %p3035_p8 = pmov %p3034_p5 }
  0x61   : > { %p3036_p4 = pmov %p3034_p5 }
  0x62   : > { %1861 = vsyncadd (%p3035_p8), [#allocation4], 4294967040 }
  0x63   : > { %1863 = dma.done.wait (%p3036_p4), [#allocation7], 2048   ;;  %p3037_p9 = pmov %p3036_p4 }
  0x64   : > { %s203_s21 = sand.u32 1, %s1942_s16   ;;  %s205_s6 = sand.u32 1, %s1880_s13  }
  0x65   : > { %1865 = vsyncadd (%p3037_p9), [#allocation7], 4294965248  ;;  %s1567_s8 = sshll.u32 %s205_s6, 10  ;;  %s204_s23 = scalar_lea.sflag [#allocation4], %s203_s21 }
  0x66   : > { %s2067_s28 = scalar_lea.vmem [#allocation8], %s1567_s8  ;;  %p3038_p10 = scmp.ne.s32.totalorder %s3029_s22, 0 }
  0x68   : > { %1867 = dma.done.wait (%p3038_p10), %s204_s23, 16384  }
  0x69   : > { %1869 = vsyncadd (%p3038_p10), %s204_s23, 4294950912  ;;  %p3039_p1 = scmp.ne.s32.totalorder %s1942_s16, 0 }
  0x6a   : > { %v250_v0 = vlaneseq (!%p3039_p1)  ;;  %v230_v2 = vld [vmem:[#allocation3] sm:$0xff] (!%p3039_p1)  ;;  %v232_v9 = vld [vmem:[#allocation6] sm:$0xff] (!%p3039_p1)  ;;  %v233_v10 = vld [vmem:[#allocation6 + $0x8] sm:$0xff] (!%p3039_p1)  ;;  %vm380_vm0 = vcmask (!%p3039_p1), 7168  }
  0x6b   : > { %229 = sbr.rel (%p3039_p1) target bundleno = 341 (0x155), region = 48  ;;  %v234_v13 = vld [vmem:[#allocation6 + $0x10] sm:$0xff] (!%p3039_p1)  ;;  %v235_v18 = vld [vmem:[#allocation6 + $0x18] sm:$0xff] (!%p3039_p1)  ;;  %v236_v22 = vld [vmem:[#allocation6 + $0x20] sm:$0xff] (!%p3039_p1) }
  0x6c   : > { %v2075_v1 = vshrl.u32 (!%p3039_p1), %v250_v0, 7  ;;  %v237_v27 = vld [vmem:[#allocation6 + $0x28] sm:$0xff] (!%p3039_p1)  ;;  %v231_v31 = vld [vmem:[#allocation3 + $0x8] sm:$0xff] (!%p3039_p1)  ;;  %v238_v32 = vld [vmem:[#allocation6 + $0x30] sm:$0xff] (!%p3039_p1) }
  0x6d   : > { %v239_v36 = vld [vmem:[#allocation6 + $0x38] sm:$0xff] (!%p3039_p1)  ;;  %v240_v40 = vld [vmem:[#allocation6 + $0x40] sm:$0xff] (!%p3039_p1)  ;;  %v241_v44 = vld [vmem:[#allocation6 + $0x48] sm:$0xff] (!%p3039_p1) }
  0x6e   : > { %v252_v3 = vsub.s32 (!%p3039_p1), 0, %v2075_v1  ;;  %v256_v4 = vsub.s32 (!%p3039_p1), 1, %v2075_v1  ;;  %v260_v5 = vsub.s32 (!%p3039_p1), 2, %v2075_v1  ;;  %v264_v8 = vsub.s32 (!%p3039_p1), 3, %v2075_v1  ;;  %v242_v48 = vld [vmem:[#allocation6 + $0x50] sm:$0xff] (!%p3039_p1)  ;;  %v243_v52 = vld [vmem:[#allocation6 + $0x58] sm:$0xff] (!%p3039_p1) }
  0x6f   : > { %v268_v12 = vsub.s32 (!%p3039_p1), 4, %v2075_v1  ;;  %v272_v15 = vsub.s32 (!%p3039_p1), 5, %v2075_v1  ;;  %v276_v20 = vsub.s32 (!%p3039_p1), 6, %v2075_v1  ;;  %v280_v24 = vsub.s32 (!%p3039_p1), 7, %v2075_v1  ;;  %v244_v56 = vld [vmem:[#allocation6 + $0x60] sm:$0xff] (!%p3039_p1)  ;;  %v245_v60 = vld [vmem:[#allocation6 + $0x68] sm:$0xff] (!%p3039_p1) }
  0x70   : > { %v253_v6 = vrot.slane (!%p3039_p1), %v230_v2, %v252_v3  ;;  %v257_v7 = vrot.slane (!%p3039_p1), %v230_v2, %v256_v4  ;;  %v261_v11 = vrot.slane (!%p3039_p1), %v230_v2, %v260_v5  ;;  %v265_v14 = vrot.slane (!%p3039_p1), %v230_v2, %v264_v8  ;;  %v246_v0 = vld [vmem:[#allocation6 + $0x70] sm:$0xff] (!%p3039_p1) }
  0x71   : > { %v269_v19 = vrot.slane (!%p3039_p1), %v230_v2, %v268_v12  ;;  %v273_v23 = vrot.slane (!%p3039_p1), %v230_v2, %v272_v15  ;;  %v277_v28 = vrot.slane (!%p3039_p1), %v230_v2, %v276_v20  ;;  %v281_v33 = vrot.slane (!%p3039_p1), %v230_v2, %v280_v24 }
  0x72   : > { %v330_v16 = vmul.f32 %v253_v6, %v232_v9  ;;  %v331_v17 = vmul.f32 %v257_v7, %v233_v10  ;;  %v332_v21 = vmul.f32 %v261_v11, %v234_v13  ;;  %v333_v25 = vmul.f32 %v265_v14, %v235_v18 }
  0x73   : > { %v334_v29 = vmul.f32 %v269_v19, %v236_v22  ;;  %v335_v34 = vmul.f32 %v273_v23, %v237_v27  ;;  %v285_v37 = vrot.slane %v231_v31, %v252_v3  ;;  %v336_v38 = vmul.f32 %v277_v28, %v238_v32 }
  0x74   : > { %v346_v26 = vadd.f32 %v331_v17, %v330_v16  ;;  %v289_v41 = vrot.slane %v231_v31, %v256_v4  ;;  %v337_v42 = vmul.f32 %v281_v33, %v239_v36  ;;  %v293_v45 = vrot.slane %v231_v31, %v260_v5  ;;  %v247_v4 = vld [vmem:[#allocation6 + $0x78] sm:$0xff] }
  0x75   : > { %v338_v46 = vmul.f32 %v285_v37, %v240_v40  ;;  %v297_v49 = vrot.slane %v231_v31, %v264_v8  ;;  %v301_v53 = vrot.slane %v231_v31, %v268_v12  ;;  %v305_v57 = vrot.slane %v231_v31, %v272_v15 }
  0x76   : > { %v347_v30 = vadd.f32 %v346_v26, %v332_v21  ;;  %v339_v50 = vmul.f32 %v289_v41, %v241_v44  ;;  %v340_v54 = vmul.f32 %v293_v45, %v242_v48  ;;  %v309_v61 = vrot.slane %v231_v31, %v276_v20 }
  0x77   : > { %v341_v58 = vmul.f32 %v297_v49, %v243_v52  ;;  %v342_v62 = vmul.f32 %v301_v53, %v244_v56  ;;  %v313_v1 = vrot.slane %v231_v31, %v280_v24  ;;  %v343_v2 = vmul.f32 %v305_v57, %v245_v60 }
  0x78   : > { %v348_v35 = vadd.f32 %v347_v30, %v333_v25  ;;  %v344_v5 = vmul.f32 %v309_v61, %v246_v0 }
  0x79   : > { %v345_v7 = vmul.f32 %v313_v1, %v247_v4 }
  0x7a   : > { %v349_v39 = vadd.f32 %v348_v35, %v334_v29 }
  0x7c   : > { %v350_v43 = vadd.f32 %v349_v39, %v335_v34 }
  0x7e   : > { %v351_v47 = vadd.f32 %v350_v43, %v336_v38 }
  0x80   : > { %v352_v51 = vadd.f32 %v351_v47, %v337_v42 }
  0x82   : > { %v353_v55 = vadd.f32 %v352_v51, %v338_v46 }
  0x84   : > { %v354_v59 = vadd.f32 %v353_v55, %v339_v50 }
  0x86   : > { %v355_v63 = vadd.f32 %v354_v59, %v340_v54 }
  0x88   : > { %v356_v3 = vadd.f32 %v355_v63, %v341_v58 }
  0x8a   : > { %v357_v6 = vadd.f32 %v356_v3, %v342_v62 }
  0x8c   : > { %v358_v8 = vadd.f32 %v357_v6, %v343_v2 }
  0x8e   : > { %v359_v9 = vadd.f32 %v358_v8, %v344_v5 }
  0x90   : > { %v360_v10 = vadd.f32 %v359_v9, %v345_v7 }
  0x92   : > { %361 = vadd.xlane.f32.xlu0 %v360_v10 }
 0x11f   : > { %v362_v11 = vpop.xlane.xlu0 %361 }
 0x120   : > { %v363_v12 = vrot.slane %v362_v11, 4 }
 0x122   : > { %v364_v13 = vmax.f32 %v362_v11, %v363_v12 }
 0x124   : > { %v365_v14 = vrot.slane %v364_v13, 2 }
 0x126   : > { %v366_v15 = vmax.f32 %v364_v13, %v365_v14 }
 0x128   : > { %v367_v16 = vrot.slane %v366_v15, 1 }
 0x12a   : > { %v368_v17 = vmax.f32 %v366_v15, %v367_v16 }
 0x12c   : > { %v369_v18 = vsub.f32 %v362_v11, %v368_v17 }
 0x12e   : > { %v370_v19 = vmul.f32 1.442695, %v369_v18 }
 0x130   : > { %1655 = vpow2.f32 %v370_v19 }
 0x13a   : > { %v1656_v20 = vpop.eup %1655 }
 0x13b   : > { %v372_v21 = vrot.slane %v1656_v20, 4 }
 0x13d   : > { %v373_v22 = vadd.f32 %v1656_v20, %v372_v21 }
 0x13f   : > { %v374_v23 = vrot.slane %v373_v22, 2 }
 0x141   : > { %v375_v24 = vadd.f32 %v374_v23, %v373_v22 }
 0x143   : > { %v376_v25 = vrot.slane %v375_v24, 1 }
 0x145   : > { %v377_v26 = vadd.f32 %v376_v25, %v375_v24 }
 0x147   : > { %1657 = vrcp.f32 %v377_v26 }
 0x151   : > { %v1658_v27 = vpop.eup %1657 }
 0x152   : > { %v379_v28 = vmul.f32 %v1658_v27, %v1656_v20 }
 0x154   : > { %381 = vst.msk [vmem:[#allocation2] sm:$0xff] %vm380_vm0, %v379_v28 }
 0x155 PF: > { %v388_v29 = vlaneseq  ;;  %v1898_v30 = vmov 0   ;;  %v1899_v31 = vmov 1966171168   ;;  %v433_v59 = vld [vmem:[%s2067_s28] sm:$0xff]  ;;  %v434_v60 = vld [vmem:[%s2067_s28 + $0x8] sm:$0xff]  ;;  %v435_v61 = vld [vmem:[%s2067_s28 + $0x10] sm:$0xff] }
 0x156   : > { %1659 = vset.pattern.permute.xlu0 %v1898_v30  ;;  %v386_v32 = vunpack.c.l.s4 %v1899_v31  ;;  %1660 = vset.pattern.permute.xlu1 %v1898_v30  ;;  %v436_v62 = vld [vmem:[%s2067_s28 + $0x18] sm:$0xff]  ;;  %v437_v63 = vld [vmem:[%s2067_s28 + $0x20] sm:$0xff]  ;;  %v438_v0 = vld [vmem:[%s2067_s28 + $0x28] sm:$0xff]  ;;  %s1569_s22 = sshll.u32 %s1942_s16, 7  ;;  %p1570_p2 = scmp.ne.s32.totalorder %s1942_s16, 2 }
 0x157   : > { %v389_v34 = vshrl.u32 %v388_v29, 7  ;;  %v439_v1 = vld [vmem:[%s2067_s28 + $0x30] sm:$0xff]  ;;  %v440_v2 = vld [vmem:[%s2067_s28 + $0x38] sm:$0xff]  ;;  %v441_v3 = vld [vmem:[%s2067_s28 + $0x40] sm:$0xff]  ;;  %s866_s9 = scalar_lea.vmem [#allocation9], %s1569_s22 }
 0x158   : > { %v387_v35 = vunpack.c.0.s8 %v386_v32  ;;  %v442_v4 = vld [vmem:[%s2067_s28 + $0x48] sm:$0xff]  ;;  %v443_v5 = vld [vmem:[%s2067_s28 + $0x50] sm:$0xff]  ;;  %v444_v6 = vld [vmem:[%s2067_s28 + $0x58] sm:$0xff] }
 0x159   : > { %v563_v39 = vsub.s32 0, %v389_v34  ;;  %v445_v7 = vld [vmem:[%s2067_s28 + $0x60] sm:$0xff]  ;;  %v446_v8 = vld [vmem:[%s2067_s28 + $0x68] sm:$0xff]  ;;  %v447_v9 = vld [vmem:[%s2067_s28 + $0x70] sm:$0xff] }
 0x15a   : > { %v390_v37 = vsub.s32 %v387_v35, %v389_v34  ;;  %v448_v10 = vld [vmem:[%s2067_s28 + $0x78] sm:$0xff]  ;;  %v465_v12 = vld [vmem:[%s2067_s28 + $0x100] sm:$0xff]  ;;  %v466_v13 = vld [vmem:[%s2067_s28 + $0x108] sm:$0xff] }
 0x15b   : > { %v382_v33 = vld [vmem:[#allocation2] sm:$0xff]  ;;  %v467_v14 = vld [vmem:[%s2067_s28 + $0x110] sm:$0xff]  ;;  %v468_v15 = vld [vmem:[%s2067_s28 + $0x118] sm:$0xff] }
 0x15c   : > { %v384_v36 = vcombine.high %v382_v33, %v382_v33  ;;  %v391_v38 = vrot.slane %v382_v33, %v390_v37  ;;  %v469_v20 = vld [vmem:[%s2067_s28 + $0x120] sm:$0xff]  ;;  %v470_v21 = vld [vmem:[%s2067_s28 + $0x128] sm:$0xff]  ;;  %v471_v22 = vld [vmem:[%s2067_s28 + $0x130] sm:$0xff] }
 0x15d   : > { %v472_v23 = vld [vmem:[%s2067_s28 + $0x138] sm:$0xff]  ;;  %v473_v28 = vld [vmem:[%s2067_s28 + $0x140] sm:$0xff]  ;;  %v474_v29 = vld [vmem:[%s2067_s28 + $0x148] sm:$0xff] }
 0x15e   : > { %v398_v40 = vrot.slane %v384_v36, %v390_v37  ;;  %v407_v41 = vrot.slane %v391_v38, %v390_v37  ;;  %v399_v42 = vcombine.high %v391_v38, %v391_v38  ;;  %v475_v30 = vld [vmem:[%s2067_s28 + $0x150] sm:$0xff]  ;;  %v476_v35 = vld [vmem:[%s2067_s28 + $0x158] sm:$0xff]  ;;  %v477_v36 = vld [vmem:[%s2067_s28 + $0x160] sm:$0xff] }
 0x160   : > { %v564_v43 = vrot.slane %v407_v41, %v563_v39  ;;  %v429_v44 = vcombine.high %v407_v41, %v407_v41  ;;  %v421_v45 = vrot.slane %v399_v42, %v390_v37  ;;  %v400_v46 = vcombine.high %v398_v40, %v398_v40  ;;  %v479_v42 = vld [vmem:[%s2067_s28 + $0x170] sm:$0xff] }
 0x161   : > { %v414_v50 = vrot.slane %v398_v40, %v390_v37 }
 0x162   : > { %594 = vperm.xlu0 %1659, %v564_v43   ;;  %v572_v47 = vrot.slane %v429_v44, %v563_v39  ;;  %v568_v48 = vrot.slane %v421_v45, %v563_v39  ;;  %v431_v49 = vcombine.high %v421_v45, %v421_v45  ;;  %v428_v52 = vrot.slane %v400_v46, %v390_v37  ;;  %v478_v37 = vld [vmem:[%s2067_s28 + $0x168] sm:$0xff]  ;;  %v480_v43 = vld [vmem:[%s2067_s28 + $0x178] sm:$0xff]  ;;  %v449_v45 = vld [vmem:[%s2067_s28 + $0x80] sm:$0xff] }
 0x163   : > { %v580_v53 = vrot.slane %v414_v50, %v563_v39  ;;  %v430_v54 = vcombine.high %v414_v50, %v414_v50  ;;  %v450_v50 = vld [vmem:[%s2067_s28 + $0x88] sm:$0xff] }
 0x164   : > { %602 = vperm.xlu1 %1660, %v572_v47   ;;  %v576_v51 = vrot.slane %v431_v49, %v563_v39  ;;  %v584_v55 = vrot.slane %v428_v52, %v563_v39  ;;  %v432_v56 = vcombine.high %v428_v52, %v428_v52  ;;  %v452_v52 = vld [vmem:[%s2067_s28 + $0x98] sm:$0xff] }
 0x165   : > { %v588_v57 = vrot.slane %v430_v54, %v563_v39 }
 0x166   : > { %598 = vperm.xlu0 %1659, %v568_v48   ;;  %v592_v58 = vrot.slane %v432_v56, %v563_v39 }
 0x168   : > { %606 = vperm.xlu1 %1660, %v576_v51   ;;  %v451_v51 = vld [vmem:[%s2067_s28 + $0x90] sm:$0xff] }
 0x16a   : > { %610 = vperm.xlu0 %1659, %v580_v53  }
 0x16c   : > { %614 = vperm.xlu1 %1660, %v584_v55  }
 0x16e   : > { %618 = vperm.xlu0 %1659, %v588_v57   ;;  %v453_v57 = vld [vmem:[%s2067_s28 + $0xa0] sm:$0xff] }
 0x170   : > { %622 = vperm.xlu1 %1660, %v592_v58   ;;  %v454_v58 = vld [vmem:[%s2067_s28 + $0xa8] sm:$0xff] }
 0x1e1   : > { %v595_v11 = vpop.permute.xlu0 %594 }
 0x1e2   : > { %v2105_v16 = vmul.f32 %v595_v11, %v433_v59  ;;  %v2107_v17 = vmul.f32 %v595_v11, %v434_v60  ;;  %v2109_v18 = vmul.f32 %v595_v11, %v435_v61  ;;  %v2111_v19 = vmul.f32 %v595_v11, %v436_v62  ;;  %v455_v59 = vld [vmem:[%s2067_s28 + $0xb0] sm:$0xff] }
 0x1e3   : > { %v2117_v24 = vmul.f32 %v595_v11, %v437_v63  ;;  %v2119_v25 = vmul.f32 %v595_v11, %v438_v0  ;;  %v2121_v26 = vmul.f32 %v595_v11, %v439_v1  ;;  %v2123_v27 = vmul.f32 %v595_v11, %v440_v2  ;;  %v603_v44 = vpop.permute.xlu1 %602  ;;  %v456_v1 = vld [vmem:[%s2067_s28 + $0xb8] sm:$0xff]  ;;  %v457_v2 = vld [vmem:[%s2067_s28 + $0xc0] sm:$0xff] }
 0x1e4   : > { %v2128_v31 = vmul.f32 %v595_v11, %v441_v3  ;;  %v2130_v32 = vmul.f32 %v595_v11, %v442_v4  ;;  %v2132_v33 = vmul.f32 %v595_v11, %v443_v5  ;;  %v2134_v34 = vmul.f32 %v595_v11, %v444_v6  ;;  %v458_v3 = vld [vmem:[%s2067_s28 + $0xc8] sm:$0xff] }
 0x1e5   : > { %v2139_v38 = vmul.f32 %v595_v11, %v445_v7  ;;  %v2141_v39 = vmul.f32 %v595_v11, %v446_v8  ;;  %v2143_v40 = vmul.f32 %v595_v11, %v447_v9  ;;  %v2145_v41 = vmul.f32 %v595_v11, %v448_v10  ;;  %v599_v60 = vpop.permute.xlu0 %598  ;;  %v459_v8 = vld [vmem:[%s2067_s28 + $0xd0] sm:$0xff]  ;;  %v460_v9 = vld [vmem:[%s2067_s28 + $0xd8] sm:$0xff]  ;;  %v461_v10 = vld [vmem:[%s2067_s28 + $0xe0] sm:$0xff] }
 0x1e6   : > { %v2150_v46 = vmul.f32 %v603_v44, %v465_v12  ;;  %v2152_v47 = vmul.f32 %v603_v44, %v466_v13  ;;  %v2154_v48 = vmul.f32 %v603_v44, %v467_v14  ;;  %v2156_v49 = vmul.f32 %v603_v44, %v468_v15  ;;  %v462_v11 = vld [vmem:[%s2067_s28 + $0xe8] sm:$0xff]  ;;  %v463_v12 = vld [vmem:[%s2067_s28 + $0xf0] sm:$0xff]  ;;  %v464_v13 = vld [vmem:[%s2067_s28 + $0xf8] sm:$0xff] }
 0x1e7   : > { %v2161_v53 = vmul.f32 %v603_v44, %v469_v20  ;;  %v2163_v54 = vmul.f32 %v603_v44, %v470_v21  ;;  %v2165_v55 = vmul.f32 %v603_v44, %v471_v22  ;;  %v2167_v56 = vmul.f32 %v603_v44, %v472_v23 }
 0x1e8   : > { %v2172_v61 = vmul.f32 %v603_v44, %v473_v28  ;;  %v2174_v62 = vmul.f32 %v603_v44, %v474_v29  ;;  %v2176_v63 = vmul.f32 %v603_v44, %v475_v30  ;;  %v2178_v0 = vmul.f32 %v603_v44, %v476_v35 }
 0x1e9   : > { %v2183_v4 = vmul.f32 %v603_v44, %v477_v36  ;;  %v2185_v5 = vmul.f32 %v603_v44, %v478_v37  ;;  %v2187_v6 = vmul.f32 %v603_v44, %v479_v42  ;;  %v2189_v7 = vmul.f32 %v603_v44, %v480_v43 }
 0x1ea   : > { %v641_v14 = vmul.f32 %v599_v60, %v449_v45  ;;  %v642_v15 = vmul.f32 %v599_v60, %v450_v50  ;;  %v643_v20 = vmul.f32 %v599_v60, %v451_v51  ;;  %v644_v21 = vmul.f32 %v599_v60, %v452_v52  ;;  %v481_v50 = vld [vmem:[%s2067_s28 + $0x180] sm:$0xff]  ;;  %v482_v51 = vld [vmem:[%s2067_s28 + $0x188] sm:$0xff]  ;;  %v483_v52 = vld [vmem:[%s2067_s28 + $0x190] sm:$0xff] }
 0x1eb   : > { %3040 = vst [vmem:[#allocation17_spill] sm:$0xff] %v2183_v4  ;;  %3041 = vst [vmem:[#allocation18_spill] sm:$0xff] %v2185_v5  ;;  %v645_v22 = vmul.f32 %v599_v60, %v453_v57  ;;  %v646_v23 = vmul.f32 %v599_v60, %v454_v58  ;;  %v647_v28 = vmul.f32 %v599_v60, %v455_v59  ;;  %v484_v57 = vld [vmem:[%s2067_s28 + $0x198] sm:$0xff] }
 0x1ec   : > { %3042 = vst [vmem:[#allocation19_spill] sm:$0xff] %v2187_v6  ;;  %3043 = vst [vmem:[#allocation20_spill] sm:$0xff] %v2189_v7  ;;  %v648_v29 = vmul.f32 %v599_v60, %v456_v1  ;;  %v649_v30 = vmul.f32 %v599_v60, %v457_v2  ;;  %v650_v35 = vmul.f32 %v599_v60, %v458_v3  ;;  %v486_v3 = vld [vmem:[%s2067_s28 + $0x1a8] sm:$0xff] }
 0x1ed   : > { %v651_v36 = vmul.f32 %v599_v60, %v459_v8  ;;  %v652_v37 = vmul.f32 %v599_v60, %v460_v9  ;;  %v653_v42 = vmul.f32 %v599_v60, %v461_v10  ;;  %v654_v43 = vmul.f32 %v599_v60, %v462_v11  ;;  %v487_v8 = vld [vmem:[%s2067_s28 + $0x1b0] sm:$0xff]  ;;  %v488_v9 = vld [vmem:[%s2067_s28 + $0x1b8] sm:$0xff]  ;;  %v490_v11 = vld [vmem:[%s2067_s28 + $0x1c8] sm:$0xff] }
 0x1ee   : > { %v655_v44 = vmul.f32 %v599_v60, %v463_v12  ;;  %v656_v45 = vmul.f32 %v599_v60, %v464_v13  ;;  %v2202_v58 = vadd.f32 %v641_v14, %v2105_v16  ;;  %v2205_v59 = vadd.f32 %v642_v15, %v2107_v17  ;;  %v485_v60 = vld [vmem:[%s2067_s28 + $0x1a0] sm:$0xff]  ;;  %v491_v12 = vld [vmem:[%s2067_s28 + $0x1d0] sm:$0xff]  ;;  %v607_v13 = vpop.permute.xlu1 %606 }
 0x1ef   : > { %v2208_v1 = vadd.f32 %v643_v20, %v2109_v18  ;;  %v2211_v2 = vadd.f32 %v644_v21, %v2111_v19  ;;  %v2218_v10 = vadd.f32 %v645_v22, %v2117_v24  ;;  %v2221_v16 = vadd.f32 %v646_v23, %v2119_v25  ;;  %v489_v19 = vld [vmem:[%s2067_s28 + $0x1c0] sm:$0xff]  ;;  %v494_v20 = vld [vmem:[%s2067_s28 + $0x1e8] sm:$0xff]  ;;  %v496_v22 = vld [vmem:[%s2067_s28 + $0x1f8] sm:$0xff] }
 0x1f0   : > { %v2224_v17 = vadd.f32 %v647_v28, %v2121_v26  ;;  %v2227_v18 = vadd.f32 %v648_v29, %v2123_v27  ;;  %v2233_v14 = vadd.f32 %v649_v30, %v2128_v31  ;;  %v2236_v24 = vadd.f32 %v650_v35, %v2130_v32  ;;  %v492_v27 = vld [vmem:[%s2067_s28 + $0x1d8] sm:$0xff]  ;;  %v493_v15 = vld [vmem:[%s2067_s28 + $0x1e0] sm:$0xff]  ;;  %v498_v35 = vld [vmem:[%s2067_s28 + $0x208] sm:$0xff] }
 0x1f1   : > { %v2239_v25 = vadd.f32 %v651_v36, %v2132_v33  ;;  %v2242_v26 = vadd.f32 %v652_v37, %v2134_v34  ;;  %v2248_v21 = vadd.f32 %v653_v42, %v2139_v38  ;;  %v2251_v31 = vadd.f32 %v654_v43, %v2141_v39  ;;  %v495_v34 = vld [vmem:[%s2067_s28 + $0x1f0] sm:$0xff]  ;;  %v497_v23 = vld [vmem:[%s2067_s28 + $0x200] sm:$0xff]  ;;  %v611_v43 = vpop.permute.xlu0 %610 }
 0x1f2   : > { %v2254_v32 = vadd.f32 %v655_v44, %v2143_v40  ;;  %v2257_v33 = vadd.f32 %v656_v45, %v2145_v41  ;;  %v673_v28 = vmul.f32 %v607_v13, %v481_v50  ;;  %v674_v29 = vmul.f32 %v607_v13, %v482_v51  ;;  %v499_v39 = vld [vmem:[%s2067_s28 + $0x210] sm:$0xff]  ;;  %v500_v40 = vld [vmem:[%s2067_s28 + $0x218] sm:$0xff]  ;;  %v501_v44 = vld [vmem:[%s2067_s28 + $0x220] sm:$0xff] }
 0x1f3   : > { %3044 = vst [vmem:[#allocation21_spill] sm:$0xff] %v2248_v21  ;;  %3045 = vst [vmem:[#allocation22_spill] sm:$0xff] %v2251_v31  ;;  %v675_v30 = vmul.f32 %v607_v13, %v483_v52  ;;  %v676_v38 = vmul.f32 %v607_v13, %v484_v57  ;;  %v677_v36 = vmul.f32 %v607_v13, %v485_v60  ;;  %v502_v45 = vld [vmem:[%s2067_s28 + $0x228] sm:$0xff]  ;;  %v503_v50 = vld [vmem:[%s2067_s28 + $0x230] sm:$0xff] }
 0x1f4   : > { %3046 = vst [vmem:[#allocation23_spill] sm:$0xff] %v2254_v32  ;;  %3047 = vst [vmem:[#allocation24_spill] sm:$0xff] %v2257_v33  ;;  %v678_v37 = vmul.f32 %v607_v13, %v486_v3  ;;  %v679_v41 = vmul.f32 %v607_v13, %v487_v8  ;;  %v680_v42 = vmul.f32 %v607_v13, %v488_v9  ;;  %v504_v3 = vld [vmem:[%s2067_s28 + $0x238] sm:$0xff]  ;;  %v505_v8 = vld [vmem:[%s2067_s28 + $0x240] sm:$0xff] }
 0x1f5   : > { %v2268_v51 = vmul.f32 %v607_v13, %v489_v19  ;;  %v2270_v52 = vmul.f32 %v607_v13, %v490_v11  ;;  %v2272_v57 = vmul.f32 %v607_v13, %v491_v12  ;;  %v2274_v60 = vmul.f32 %v607_v13, %v492_v27  ;;  %v506_v9 = vld [vmem:[%s2067_s28 + $0x248] sm:$0xff]  ;;  %v507_v19 = vld [vmem:[%s2067_s28 + $0x250] sm:$0xff]  ;;  %v509_v31 = vld [vmem:[%s2067_s28 + $0x260] sm:$0xff] }
 0x1f6   : > { %v2279_v33 = vmul.f32 %v607_v13, %v493_v15  ;;  %v2281_v7 = vmul.f32 %v607_v13, %v494_v20  ;;  %v2283_v32 = vmul.f32 %v607_v13, %v495_v34  ;;  %v2285_v6 = vmul.f32 %v607_v13, %v496_v22  ;;  %v510_v11 = vld [vmem:[%s2067_s28 + $0x268] sm:$0xff]  ;;  %v512_v12 = vld [vmem:[%s2067_s28 + $0x278] sm:$0xff] }
 0x1f7   : > { %3048 = vst [vmem:[#allocation25_spill] sm:$0xff] %v2268_v51  ;;  %3049 = vst [vmem:[#allocation26_spill] sm:$0xff] %v2270_v52  ;;  %v508_v51 = vld [vmem:[%s2067_s28 + $0x258] sm:$0xff]  ;;  %v511_v52 = vld [vmem:[%s2067_s28 + $0x270] sm:$0xff]  ;;  %v690_v27 = vmul.f32 %v611_v43, %v498_v35  ;;  %v692_v5 = vmul.f32 %v611_v43, %v500_v40  ;;  %v693_v21 = vmul.f32 %v611_v43, %v501_v44 }
 0x1f8   : > { %3050 = vst [vmem:[#allocation27_spill] sm:$0xff] %v2272_v57  ;;  %3051 = vst [vmem:[#allocation28_spill] sm:$0xff] %v2274_v60  ;;  %v689_v57 = vmul.f32 %v611_v43, %v497_v23  ;;  %v691_v60 = vmul.f32 %v611_v43, %v499_v39  ;;  %v694_v4 = vmul.f32 %v611_v43, %v502_v45 }
 0x1f9   : > { %3052 = vst [vmem:[#allocation29_spill] sm:$0xff] %v2279_v33  ;;  %3053 = vst [vmem:[#allocation30_spill] sm:$0xff] %v2283_v32  ;;  %v695_v15 = vmul.f32 %v611_v43, %v503_v50  ;;  %v696_v33 = vmul.f32 %v611_v43, %v504_v3  ;;  %v2293_v20 = vmul.f32 %v611_v43, %v505_v8  ;;  %v520_v3 = vld [vmem:[%s2067_s28 + $0x2b8] sm:$0xff] }
 0x1fa   : > { %3054 = vst [vmem:[#allocation31_spill] sm:$0xff] %v2285_v6  ;;  %v2295_v34 = vmul.f32 %v611_v43, %v506_v9  ;;  %v2297_v13 = vmul.f32 %v611_v43, %v507_v19  ;;  %v2299_v22 = vmul.f32 %v611_v43, %v508_v51  ;;  %v2301_v6 = vmul.f32 %v611_v43, %v509_v31 }
 0x1fb   : > { %v2303_v32 = vmul.f32 %v611_v43, %v510_v11  ;;  %v2305_v23 = vmul.f32 %v611_v43, %v511_v52  ;;  %v2307_v35 = vmul.f32 %v611_v43, %v512_v12  ;;  %v754_v39 = vadd.f32 %v2202_v58, %v2150_v46 }
 0x1fc   : > { %v761_v40 = vadd.f32 %v2205_v59, %v2152_v47  ;;  %v768_v44 = vadd.f32 %v2208_v1, %v2154_v48  ;;  %v775_v45 = vadd.f32 %v2211_v2, %v2156_v49  ;;  %v782_v31 = vadd.f32 %v2218_v10, %v2161_v53 }
 0x1fd   : > { %v789_v50 = vadd.f32 %v2221_v16, %v2163_v54  ;;  %v796_v43 = vadd.f32 %v2224_v17, %v2165_v55  ;;  %v803_v46 = vadd.f32 %v2227_v18, %v2167_v56  ;;  %v755_v58 = vadd.f32 %v754_v39, %v673_v28 }
 0x1fe   : > { %v762_v47 = vadd.f32 %v761_v40, %v674_v29  ;;  %v769_v59 = vadd.f32 %v768_v44, %v675_v30  ;;  %v776_v51 = vadd.f32 %v775_v45, %v676_v38  ;;  %v783_v48 = vadd.f32 %v782_v31, %v677_v36  ;;  %v514_v30 = vld [vmem:[%s2067_s28 + $0x288] sm:$0xff]  ;;  %v515_v38 = vld [vmem:[%s2067_s28 + $0x290] sm:$0xff]  ;;  %v3055_v36 = vld [vmem:[#allocation17_spill] sm:$0xff]  ;;  %v615_v40 = vpop.permute.xlu1 %614 }
 0x1ff   : > { %v790_v1 = vadd.f32 %v789_v50, %v678_v37  ;;  %v797_v49 = vadd.f32 %v796_v43, %v679_v41  ;;  %v804_v53 = vadd.f32 %v803_v46, %v680_v42  ;;  %v2325_v2 = vadd.f32 %v755_v58, %v689_v57  ;;  %v3056_v37 = vld [vmem:[#allocation21_spill] sm:$0xff]  ;;  %v3064_v19 = vld [vmem:[#allocation26_spill] sm:$0xff]  ;;  %v3065_v12 = vld [vmem:[#allocation27_spill] sm:$0xff] }
 0x200   : > { %v2327_v54 = vadd.f32 %v762_v47, %v690_v27  ;;  %v2329_v55 = vadd.f32 %v769_v59, %v691_v60  ;;  %v2331_v10 = vadd.f32 %v776_v51, %v692_v5  ;;  %v2333_v56 = vadd.f32 %v783_v48, %v693_v21  ;;  %v513_v21 = vld [vmem:[%s2067_s28 + $0x280] sm:$0xff]  ;;  %v519_v60 = vld [vmem:[%s2067_s28 + $0x2b0] sm:$0xff]  ;;  %v522_v45 = vld [vmem:[%s2067_s28 + $0x2c8] sm:$0xff] }
 0x201   : > { %v2335_v16 = vadd.f32 %v790_v1, %v694_v4  ;;  %v2337_v17 = vadd.f32 %v797_v49, %v695_v15  ;;  %v2339_v18 = vadd.f32 %v804_v53, %v696_v33  ;;  %v810_v28 = vadd.f32 %v2233_v14, %v2172_v61  ;;  %v516_v33 = vld [vmem:[%s2067_s28 + $0x298] sm:$0xff]  ;;  %v3057_v61 = vld [vmem:[#allocation18_spill] sm:$0xff]  ;;  %v3063_v8 = vld [vmem:[#allocation25_spill] sm:$0xff] }
 0x202   : > { %v817_v29 = vadd.f32 %v2236_v24, %v2174_v62  ;;  %v824_v5 = vadd.f32 %v2239_v25, %v2176_v63  ;;  %v831_v4 = vadd.f32 %v2242_v26, %v2178_v0  ;;  %v838_v41 = vadd.f32 %v3056_v37, %v3055_v36  ;;  %v3058_v14 = vld [vmem:[#allocation22_spill] sm:$0xff]  ;;  %v3059_v62 = vld [vmem:[#allocation19_spill] sm:$0xff]  ;;  %v3061_v63 = vld [vmem:[#allocation20_spill] sm:$0xff] }
 0x203   : > { %v845_v42 = vadd.f32 %v3058_v14, %v3057_v61  ;;  %v3060_v24 = vld [vmem:[#allocation23_spill] sm:$0xff]  ;;  %v3062_v25 = vld [vmem:[#allocation24_spill] sm:$0xff]  ;;  %v517_v0 = vld [vmem:[%s2067_s28 + $0x2a0] sm:$0xff]  ;;  %v811_v9 = vadd.f32 %v810_v28, %v3063_v8  ;;  %v705_v14 = vmul.f32 %v615_v40, %v513_v21 }
 0x204   : > { %v852_v52 = vadd.f32 %v3060_v24, %v3059_v62  ;;  %v859_v57 = vadd.f32 %v3062_v25, %v3061_v63  ;;  %v518_v26 = vld [vmem:[%s2067_s28 + $0x2a8] sm:$0xff]  ;;  %v818_v11 = vadd.f32 %v817_v29, %v3064_v19  ;;  %v825_v27 = vadd.f32 %v824_v5, %v3065_v12  ;;  %v3066_v15 = vld [vmem:[#allocation28_spill] sm:$0xff]  ;;  %v521_v44 = vld [vmem:[%s2067_s28 + $0x2c0] sm:$0xff] }
 0x205   : > { %v832_v39 = vadd.f32 %v831_v4, %v3066_v15  ;;  %v523_v31 = vld [vmem:[%s2067_s28 + $0x2d0] sm:$0xff]  ;;  %v3067_v50 = vld [vmem:[#allocation29_spill] sm:$0xff]  ;;  %v846_v46 = vadd.f32 %v845_v42, %v2281_v7  ;;  %v3068_v58 = vld [vmem:[#allocation30_spill] sm:$0xff]  ;;  %v2380_v53 = vadd.f32 %v811_v9, %v2293_v20  ;;  %v706_v42 = vmul.f32 %v615_v40, %v514_v30 }
 0x206   : > { %v839_v43 = vadd.f32 %v838_v41, %v3067_v50  ;;  %v853_v47 = vadd.f32 %v852_v52, %v3068_v58  ;;  %v3069_v59 = vld [vmem:[#allocation31_spill] sm:$0xff]  ;;  %v524_v48 = vld [vmem:[%s2067_s28 + $0x2d8] sm:$0xff]  ;;  %v525_v1 = vld [vmem:[%s2067_s28 + $0x2e0] sm:$0xff]  ;;  %v2383_v28 = vadd.f32 %v818_v11, %v2295_v34  ;;  %v2386_v29 = vadd.f32 %v825_v27, %v2297_v13  ;;  %v619_v52 = vpop.permute.xlu0 %618 }
 0x207   : > { %v860_v51 = vadd.f32 %v859_v57, %v3069_v59  ;;  %v526_v49 = vld [vmem:[%s2067_s28 + $0x2e8] sm:$0xff]  ;;  %v2389_v7 = vadd.f32 %v832_v39, %v2299_v22  ;;  %v527_v5 = vld [vmem:[%s2067_s28 + $0x2f0] sm:$0xff]  ;;  %v528_v4 = vld [vmem:[%s2067_s28 + $0x2f8] sm:$0xff]  ;;  %v2398_v20 = vadd.f32 %v846_v46, %v2303_v32  ;;  %v707_v62 = vmul.f32 %v615_v40, %v515_v38 }
 0x208   : > { %v529_v36 = vld [vmem:[%s2067_s28 + $0x300] sm:$0xff]  ;;  %v2395_v37 = vadd.f32 %v839_v43, %v2301_v6  ;;  %v2401_v34 = vadd.f32 %v853_v47, %v2305_v23  ;;  %v530_v22 = vld [vmem:[%s2067_s28 + $0x308] sm:$0xff]  ;;  %v531_v41 = vld [vmem:[%s2067_s28 + $0x310] sm:$0xff]  ;;  %v708_v6 = vmul.f32 %v615_v40, %v516_v33  ;;  %v709_v63 = vmul.f32 %v615_v40, %v517_v0 }
 0x209   : > { %3070 = vst [vmem:[#allocation17_spill] sm:$0xff] %v2398_v20  ;;  %v2404_v13 = vadd.f32 %v860_v51, %v2307_v35  ;;  %v532_v61 = vld [vmem:[%s2067_s28 + $0x318] sm:$0xff]  ;;  %v533_v24 = vld [vmem:[%s2067_s28 + $0x320] sm:$0xff]  ;;  %v534_v32 = vld [vmem:[%s2067_s28 + $0x328] sm:$0xff]  ;;  %v710_v35 = vmul.f32 %v615_v40, %v518_v26  ;;  %v711_v25 = vmul.f32 %v615_v40, %v519_v60  ;;  %v712_v57 = vmul.f32 %v615_v40, %v520_v3 }
 0x20a   : > { %3071 = vst [vmem:[#allocation21_spill] sm:$0xff] %v2401_v34  ;;  %v535_v23 = vld [vmem:[%s2067_s28 + $0x330] sm:$0xff]  ;;  %v536_v8 = vld [vmem:[%s2067_s28 + $0x338] sm:$0xff]  ;;  %v537_v9 = vld [vmem:[%s2067_s28 + $0x340] sm:$0xff]  ;;  %v713_v30 = vmul.f32 %v615_v40, %v521_v44  ;;  %v714_v38 = vmul.f32 %v615_v40, %v522_v45  ;;  %v715_v33 = vmul.f32 %v615_v40, %v523_v31  ;;  %v716_v19 = vmul.f32 %v615_v40, %v524_v48 }
 0x20b   : > { %3072 = vst [vmem:[#allocation18_spill] sm:$0xff] %v2404_v13  ;;  %v538_v21 = vld [vmem:[%s2067_s28 + $0x348] sm:$0xff]  ;;  %v539_v11 = vld [vmem:[%s2067_s28 + $0x350] sm:$0xff]  ;;  %v540_v12 = vld [vmem:[%s2067_s28 + $0x358] sm:$0xff]  ;;  %v717_v15 = vmul.f32 %v615_v40, %v525_v1  ;;  %v718_v39 = vmul.f32 %v615_v40, %v526_v49  ;;  %v719_v50 = vmul.f32 %v615_v40, %v527_v5  ;;  %v720_v0 = vmul.f32 %v615_v40, %v528_v4 }
 0x20c   : > { %v541_v27 = vld [vmem:[%s2067_s28 + $0x360] sm:$0xff]  ;;  %v542_v26 = vld [vmem:[%s2067_s28 + $0x368] sm:$0xff]  ;;  %v543_v60 = vld [vmem:[%s2067_s28 + $0x370] sm:$0xff]  ;;  %v721_v3 = vmul.f32 %v619_v52, %v529_v36  ;;  %v722_v46 = vmul.f32 %v619_v52, %v530_v22  ;;  %v723_v58 = vmul.f32 %v619_v52, %v531_v41  ;;  %v724_v47 = vmul.f32 %v619_v52, %v532_v61 }
 0x20d   : > { %v544_v43 = vld [vmem:[%s2067_s28 + $0x378] sm:$0xff]  ;;  %v725_v59 = vmul.f32 %v619_v52, %v533_v24  ;;  %v726_v51 = vmul.f32 %v619_v52, %v534_v32  ;;  %v727_v44 = vmul.f32 %v619_v52, %v535_v23  ;;  %v728_v45 = vmul.f32 %v619_v52, %v536_v8 }
 0x20e   : > { %v729_v31 = vmul.f32 %v619_v52, %v537_v9  ;;  %v730_v48 = vmul.f32 %v619_v52, %v538_v21  ;;  %v731_v13 = vmul.f32 %v619_v52, %v539_v11  ;;  %v732_v34 = vmul.f32 %v619_v52, %v540_v12  ;;  %v552_v12 = vld [vmem:[%s2067_s28 + $0x3b8] sm:$0xff] }
 0x20f   : > { %v733_v20 = vmul.f32 %v619_v52, %v541_v27  ;;  %v734_v1 = vmul.f32 %v619_v52, %v542_v26  ;;  %v735_v49 = vmul.f32 %v619_v52, %v543_v60  ;;  %v736_v5 = vmul.f32 %v619_v52, %v544_v43  ;;  %v553_v27 = vld [vmem:[%s2067_s28 + $0x3c0] sm:$0xff]  ;;  %v555_v60 = vld [vmem:[%s2067_s28 + $0x3d0] sm:$0xff]  ;;  %v556_v43 = vld [vmem:[%s2067_s28 + $0x3d8] sm:$0xff] }
 0x210   : > { %v757_v40 = vadd.f32 %v2325_v2, %v705_v14  ;;  %v764_v4 = vadd.f32 %v2327_v54, %v706_v42  ;;  %v771_v36 = vadd.f32 %v2329_v55, %v707_v62  ;;  %v778_v22 = vadd.f32 %v2331_v10, %v708_v6  ;;  %v545_v42 = vld [vmem:[%s2067_s28 + $0x380] sm:$0xff]  ;;  %v546_v6 = vld [vmem:[%s2067_s28 + $0x388] sm:$0xff] }
 0x211   : > { %v785_v41 = vadd.f32 %v2333_v56, %v709_v63  ;;  %v792_v61 = vadd.f32 %v2335_v16, %v710_v35  ;;  %v799_v24 = vadd.f32 %v2337_v17, %v711_v25  ;;  %v806_v32 = vadd.f32 %v2339_v18, %v712_v57  ;;  %v547_v63 = vld [vmem:[%s2067_s28 + $0x390] sm:$0xff]  ;;  %v548_v35 = vld [vmem:[%s2067_s28 + $0x398] sm:$0xff]  ;;  %v3073_v57 = vld [vmem:[#allocation17_spill] sm:$0xff] }
 0x212   : > { %v758_v23 = vadd.f32 %v757_v40, %v721_v3  ;;  %v765_v2 = vadd.f32 %v764_v4, %v722_v46  ;;  %v772_v14 = vadd.f32 %v771_v36, %v723_v58  ;;  %v779_v52 = vadd.f32 %v778_v22, %v724_v47  ;;  %v3074_v9 = vld [vmem:[#allocation21_spill] sm:$0xff]  ;;  %v3075_v11 = vld [vmem:[#allocation18_spill] sm:$0xff]  ;;  %v559_v58 = vld [vmem:[%s2067_s28 + $0x3f0] sm:$0xff] }
 0x213   : > { %v786_v54 = vadd.f32 %v785_v41, %v725_v59  ;;  %v793_v55 = vadd.f32 %v792_v61, %v726_v51  ;;  %v800_v10 = vadd.f32 %v799_v24, %v727_v44  ;;  %v807_v56 = vadd.f32 %v806_v32, %v728_v45  ;;  %v557_v3 = vld [vmem:[%s2067_s28 + $0x3e0] sm:$0xff]  ;;  %v558_v46 = vld [vmem:[%s2067_s28 + $0x3e8] sm:$0xff]  ;;  %v560_v47 = vld [vmem:[%s2067_s28 + $0x3f8] sm:$0xff] }
 0x214   : > { %v813_v16 = vadd.f32 %v2380_v53, %v713_v30  ;;  %v820_v17 = vadd.f32 %v2383_v28, %v714_v38  ;;  %v827_v62 = vadd.f32 %v2386_v29, %v715_v33  ;;  %v834_v18 = vadd.f32 %v2389_v7, %v716_v19  ;;  %v549_v28 = vld [vmem:[%s2067_s28 + $0x3a0] sm:$0xff]  ;;  %v550_v29 = vld [vmem:[%s2067_s28 + $0x3a8] sm:$0xff]  ;;  %v551_v7 = vld [vmem:[%s2067_s28 + $0x3b0] sm:$0xff]  ;;  %v623_v30 = vpop.permute.xlu1 %622 }
 0x215   : > { %v841_v25 = vadd.f32 %v2395_v37, %v717_v15  ;;  %v848_v8 = vadd.f32 %v3073_v57, %v718_v39  ;;  %v855_v21 = vadd.f32 %v3074_v9, %v719_v50  ;;  %v862_v53 = vadd.f32 %v3075_v11, %v720_v0  ;;  %v554_v15 = vld [vmem:[%s2067_s28 + $0x3c8] sm:$0xff] }
 0x216   : > { %v814_v38 = vadd.f32 %v813_v16, %v729_v31  ;;  %v821_v33 = vadd.f32 %v820_v17, %v730_v48  ;;  %v828_v37 = vadd.f32 %v827_v62, %v731_v13  ;;  %v835_v19 = vadd.f32 %v834_v18, %v732_v34 }
 0x217   : > { %v842_v39 = vadd.f32 %v841_v25, %v733_v20  ;;  %v849_v50 = vadd.f32 %v848_v8, %v734_v1  ;;  %v856_v0 = vadd.f32 %v855_v21, %v735_v49  ;;  %v863_v26 = vadd.f32 %v862_v53, %v736_v5 }
 0x218   : > { %v737_v59 = vmul.f32 %v623_v30, %v545_v42  ;;  %v738_v51 = vmul.f32 %v623_v30, %v546_v6  ;;  %v739_v44 = vmul.f32 %v623_v30, %v547_v63  ;;  %v740_v45 = vmul.f32 %v623_v30, %v548_v35 }
 0x219   : > { %v741_v13 = vmul.f32 %v623_v30, %v549_v28  ;;  %v742_v34 = vmul.f32 %v623_v30, %v550_v29  ;;  %v743_v31 = vmul.f32 %v623_v30, %v551_v7  ;;  %v744_v48 = vmul.f32 %v623_v30, %v552_v12 }
 0x21a   : > { %v745_v40 = vmul.f32 %v623_v30, %v553_v27  ;;  %v746_v20 = vmul.f32 %v623_v30, %v554_v15  ;;  %v747_v1 = vmul.f32 %v623_v30, %v555_v60  ;;  %v748_v49 = vmul.f32 %v623_v30, %v556_v43 }
 0x21b   : > { %v749_v5 = vmul.f32 %v623_v30, %v557_v3  ;;  %v750_v4 = vmul.f32 %v623_v30, %v558_v46  ;;  %v751_v36 = vmul.f32 %v623_v30, %v559_v58  ;;  %v752_v22 = vmul.f32 %v623_v30, %v560_v47 }
 0x21c   : > { %v759_v41 = vadd.f32 %v758_v23, %v737_v59  ;;  %v766_v61 = vadd.f32 %v765_v2, %v738_v51  ;;  %v773_v24 = vadd.f32 %v772_v14, %v739_v44  ;;  %v780_v32 = vadd.f32 %v779_v52, %v740_v45 }
 0x21d   : > { %v787_v42 = vadd.f32 %v786_v54, %v741_v13  ;;  %v794_v16 = vadd.f32 %v793_v55, %v742_v34  ;;  %v801_v17 = vadd.f32 %v800_v10, %v743_v31  ;;  %v808_v62 = vadd.f32 %v807_v56, %v744_v48 }
 0x21e   : > { %v815_v18 = vadd.f32 %v814_v38, %v745_v40  ;;  %v822_v6 = vadd.f32 %v821_v33, %v746_v20  ;;  %v829_v63 = vadd.f32 %v828_v37, %v747_v1  ;;  %v836_v35 = vadd.f32 %v835_v19, %v748_v49  ;;  %867 = vst [vmem:[%s866_s9] sm:$0xff] %v759_v41 }
 0x21f   : > { %868 = vst [vmem:[%s866_s9 + $0x8] sm:$0xff] %v766_v61  ;;  %869 = vst [vmem:[%s866_s9 + $0x10] sm:$0xff] %v773_v24  ;;  %v843_v25 = vadd.f32 %v842_v39, %v749_v5  ;;  %v850_v57 = vadd.f32 %v849_v50, %v750_v4  ;;  %v857_v8 = vadd.f32 %v856_v0, %v751_v36 }
 0x220   : > { %870 = vst [vmem:[%s866_s9 + $0x18] sm:$0xff] %v780_v32  ;;  %v864_v23 = vadd.f32 %v863_v26, %v752_v22  ;;  %871 = vst [vmem:[%s866_s9 + $0x20] sm:$0xff] %v787_v42  ;;  %886 = sbr.rel (%p1570_p2) target bundleno = 1114 (0x45a), region = 52 }
 0x221   : > { %872 = vst [vmem:[%s866_s9 + $0x28] sm:$0xff] %v794_v16  ;;  %873 = vst [vmem:[%s866_s9 + $0x30] sm:$0xff] %v801_v17 }
 0x222   : > { %874 = vst [vmem:[%s866_s9 + $0x38] sm:$0xff] %v808_v62  ;;  %875 = vst [vmem:[%s866_s9 + $0x40] sm:$0xff] %v815_v18 }
 0x223   : > { %876 = vst [vmem:[%s866_s9 + $0x48] sm:$0xff] %v822_v6  ;;  %877 = vst [vmem:[%s866_s9 + $0x50] sm:$0xff] %v829_v63 }
 0x224   : > { %878 = vst [vmem:[%s866_s9 + $0x58] sm:$0xff] %v836_v35  ;;  %879 = vst [vmem:[%s866_s9 + $0x60] sm:$0xff] %v843_v25 }
 0x225   : > { %880 = vst [vmem:[%s866_s9 + $0x68] sm:$0xff] %v850_v57  ;;  %881 = vst [vmem:[%s866_s9 + $0x70] sm:$0xff] %v857_v8 }
 0x226   : > { %882 = vst [vmem:[%s866_s9 + $0x78] sm:$0xff] %v864_v23 }
 0x22d   : > { %v2455_v2 = vld [vmem:[#allocation9 + $0x10] sm:$0xff]  ;;  %v2457_v14 = vld [vmem:[#allocation9] sm:$0xff]  ;;  %v2461_v52 = vld [vmem:[#allocation9 + $0x18] sm:$0xff] }
 0x22e   : > { %939 = vmax.xlane.f32.xlu1 %v2455_v2  ;;  %935 = vmax.xlane.f32.xlu0 %v2457_v14  ;;  %v2463_v54 = vld [vmem:[#allocation9 + $0x8] sm:$0xff]  ;;  %v2469_v10 = vld [vmem:[#allocation9 + $0x20] sm:$0xff]  ;;  %v2473_v56 = vld [vmem:[#allocation9 + $0x38] sm:$0xff] }
 0x22f   : > { %v2467_v55 = vld [vmem:[#allocation9 + $0x28] sm:$0xff]  ;;  %v2475_v9 = vld [vmem:[#allocation9 + $0x30] sm:$0xff]  ;;  %v2481_v11 = vld [vmem:[#allocation9 + $0x40] sm:$0xff] }
 0x230   : > { %v2479_v21 = vld [vmem:[#allocation9 + $0x48] sm:$0xff]  ;;  %v2485_v53 = vld [vmem:[#allocation9 + $0x58] sm:$0xff]  ;;  %v2487_v28 = vld [vmem:[#allocation9 + $0x50] sm:$0xff] }
 0x231   : > { %3076 = vst [vmem:[#allocation32_spill] sm:$0xff] %v2485_v53  ;;  %3077 = vst [vmem:[#allocation33_spill] sm:$0xff] %v2487_v28  ;;  %v2491_v29 = vld [vmem:[#allocation9 + $0x68] sm:$0xff]  ;;  %v2493_v7 = vld [vmem:[#allocation9 + $0x60] sm:$0xff] }
 0x232   : > { %941 = vmax.xlane.f32.xlu1 %v2461_v52  ;;  %937 = vmax.xlane.f32.xlu0 %v2463_v54  ;;  %3078 = vst [vmem:[#allocation34_spill] sm:$0xff] %v2491_v29  ;;  %3079 = vst [vmem:[#allocation35_spill] sm:$0xff] %v2493_v7  ;;  %v2497_v30 = vld [vmem:[#allocation9 + $0x78] sm:$0xff]  ;;  %v2499_v38 = vld [vmem:[#allocation9 + $0x70] sm:$0xff] }
 0x233   : > { %3080 = vst [vmem:[#allocation36_spill] sm:$0xff] %v2497_v30  ;;  %3081 = vst [vmem:[#allocation37_spill] sm:$0xff] %v2499_v38  ;;  %v2503_v33 = vld [vmem:[#allocation9 + $0x88] sm:$0xff]  ;;  %v2505_v37 = vld [vmem:[#allocation9 + $0x80] sm:$0xff] }
 0x234   : > { %3082 = vst [vmem:[#allocation38_spill] sm:$0xff] %v2503_v33  ;;  %3083 = vst [vmem:[#allocation39_spill] sm:$0xff] %v2505_v37  ;;  %v2509_v19 = vld [vmem:[#allocation9 + $0x98] sm:$0xff]  ;;  %v2511_v12 = vld [vmem:[#allocation9 + $0x90] sm:$0xff] }
 0x235   : > { %3084 = vst [vmem:[#allocation40_spill] sm:$0xff] %v2509_v19  ;;  %3085 = vst [vmem:[#allocation41_spill] sm:$0xff] %v2511_v12  ;;  %v2515_v27 = vld [vmem:[#allocation9 + $0xa8] sm:$0xff]  ;;  %v2517_v15 = vld [vmem:[#allocation9 + $0xa0] sm:$0xff] }
 0x236   : > { %945 = vmax.xlane.f32.xlu1 %v2467_v55  ;;  %943 = vmax.xlane.f32.xlu0 %v2469_v10  ;;  %3086 = vst [vmem:[#allocation42_spill] sm:$0xff] %v2515_v27  ;;  %3087 = vst [vmem:[#allocation43_spill] sm:$0xff] %v2517_v15  ;;  %v2521_v39 = vld [vmem:[#allocation9 + $0xb8] sm:$0xff]  ;;  %v2523_v50 = vld [vmem:[#allocation9 + $0xb0] sm:$0xff] }
 0x237   : > { %3088 = vst [vmem:[#allocation44_spill] sm:$0xff] %v2521_v39  ;;  %3089 = vst [vmem:[#allocation45_spill] sm:$0xff] %v2523_v50  ;;  %v2527_v0 = vld [vmem:[#allocation9 + $0xc8] sm:$0xff]  ;;  %v2529_v26 = vld [vmem:[#allocation9 + $0xc0] sm:$0xff] }
 0x238   : > { %3090 = vst [vmem:[#allocation46_spill] sm:$0xff] %v2527_v0  ;;  %3091 = vst [vmem:[#allocation47_spill] sm:$0xff] %v2529_v26  ;;  %v2533_v60 = vld [vmem:[#allocation9 + $0xd8] sm:$0xff]  ;;  %v2535_v43 = vld [vmem:[#allocation9 + $0xd0] sm:$0xff] }
 0x239   : > { %3092 = vst [vmem:[#allocation48_spill] sm:$0xff] %v2533_v60  ;;  %3093 = vst [vmem:[#allocation49_spill] sm:$0xff] %v2535_v43  ;;  %v2539_v3 = vld [vmem:[#allocation9 + $0xe8] sm:$0xff]  ;;  %v2541_v46 = vld [vmem:[#allocation9 + $0xe0] sm:$0xff] }
 0x23a   : > { %949 = vmax.xlane.f32.xlu1 %v2473_v56  ;;  %947 = vmax.xlane.f32.xlu0 %v2475_v9  ;;  %3094 = vst [vmem:[#allocation50_spill] sm:$0xff] %v2539_v3  ;;  %3095 = vst [vmem:[#allocation51_spill] sm:$0xff] %v2541_v46  ;;  %v2545_v58 = vld [vmem:[#allocation9 + $0xf8] sm:$0xff]  ;;  %v2547_v47 = vld [vmem:[#allocation9 + $0xf0] sm:$0xff] }
 0x23b   : > { %3096 = vst [vmem:[#allocation52_spill] sm:$0xff] %v2545_v58  ;;  %3097 = vst [vmem:[#allocation53_spill] sm:$0xff] %v2547_v47  ;;  %v2551_v59 = vld [vmem:[#allocation9 + $0x108] sm:$0xff]  ;;  %v2553_v51 = vld [vmem:[#allocation9 + $0x100] sm:$0xff] }
 0x23c   : > { %3098 = vst [vmem:[#allocation54_spill] sm:$0xff] %v2551_v59  ;;  %3099 = vst [vmem:[#allocation55_spill] sm:$0xff] %v2553_v51  ;;  %v2557_v44 = vld [vmem:[#allocation9 + $0x118] sm:$0xff]  ;;  %v2559_v45 = vld [vmem:[#allocation9 + $0x110] sm:$0xff] }
 0x23d   : > { %3100 = vst [vmem:[#allocation56_spill] sm:$0xff] %v2557_v44  ;;  %3101 = vst [vmem:[#allocation57_spill] sm:$0xff] %v2559_v45  ;;  %v2563_v13 = vld [vmem:[#allocation9 + $0x128] sm:$0xff]  ;;  %v2565_v34 = vld [vmem:[#allocation9 + $0x120] sm:$0xff] }
 0x23e   : > { %953 = vmax.xlane.f32.xlu1 %v2479_v21  ;;  %951 = vmax.xlane.f32.xlu0 %v2481_v11  ;;  %3102 = vst [vmem:[#allocation58_spill] sm:$0xff] %v2563_v13  ;;  %3103 = vst [vmem:[#allocation59_spill] sm:$0xff] %v2565_v34  ;;  %v2569_v31 = vld [vmem:[#allocation9 + $0x138] sm:$0xff]  ;;  %v2571_v48 = vld [vmem:[#allocation9 + $0x130] sm:$0xff] }
 0x23f   : > { %3104 = vst [vmem:[#allocation60_spill] sm:$0xff] %v2569_v31  ;;  %3105 = vst [vmem:[#allocation61_spill] sm:$0xff] %v2571_v48  ;;  %v2575_v40 = vld [vmem:[#allocation9 + $0x148] sm:$0xff]  ;;  %v2577_v20 = vld [vmem:[#allocation9 + $0x140] sm:$0xff] }
 0x240   : > { %3106 = vst [vmem:[#allocation62_spill] sm:$0xff] %v2575_v40  ;;  %3107 = vst [vmem:[#allocation63_spill] sm:$0xff] %v2577_v20  ;;  %v2581_v1 = vld [vmem:[#allocation9 + $0x158] sm:$0xff]  ;;  %v2583_v49 = vld [vmem:[#allocation9 + $0x150] sm:$0xff] }
 0x241   : > { %3108 = vst [vmem:[#allocation64_spill] sm:$0xff] %v2581_v1  ;;  %3109 = vst [vmem:[#allocation65_spill] sm:$0xff] %v2583_v49  ;;  %v2587_v5 = vld [vmem:[#allocation9 + $0x168] sm:$0xff]  ;;  %v2589_v4 = vld [vmem:[#allocation9 + $0x160] sm:$0xff] }
 0x242   : > { %957 = vmax.xlane.f32.xlu1 %v2485_v53  ;;  %955 = vmax.xlane.f32.xlu0 %v2487_v28  ;;  %3110 = vst [vmem:[#allocation66_spill] sm:$0xff] %v2587_v5  ;;  %3111 = vst [vmem:[#allocation67_spill] sm:$0xff] %v2589_v4  ;;  %v2593_v36 = vld [vmem:[#allocation9 + $0x178] sm:$0xff]  ;;  %v2595_v22 = vld [vmem:[#allocation9 + $0x170] sm:$0xff] }
 0x243   : > { %3112 = vst [vmem:[#allocation68_spill] sm:$0xff] %v2593_v36  ;;  %3113 = vst [vmem:[#allocation69_spill] sm:$0xff] %v2595_v22 }
 0x246   : > { %961 = vmax.xlane.f32.xlu1 %v2491_v29  ;;  %959 = vmax.xlane.f32.xlu0 %v2493_v7 }
 0x24a   : > { %965 = vmax.xlane.f32.xlu1 %v2497_v30  ;;  %963 = vmax.xlane.f32.xlu0 %v2499_v38 }
 0x24e   : > { %969 = vmax.xlane.f32.xlu1 %v2503_v33  ;;  %967 = vmax.xlane.f32.xlu0 %v2505_v37 }
 0x252   : > { %973 = vmax.xlane.f32.xlu1 %v2509_v19  ;;  %971 = vmax.xlane.f32.xlu0 %v2511_v12 }
 0x256   : > { %977 = vmax.xlane.f32.xlu1 %v2515_v27  ;;  %975 = vmax.xlane.f32.xlu0 %v2517_v15 }
 0x25a   : > { %981 = vmax.xlane.f32.xlu1 %v2521_v39  ;;  %979 = vmax.xlane.f32.xlu0 %v2523_v50 }
 0x25e   : > { %985 = vmax.xlane.f32.xlu1 %v2527_v0  ;;  %983 = vmax.xlane.f32.xlu0 %v2529_v26 }
 0x262   : > { %989 = vmax.xlane.f32.xlu1 %v2533_v60  ;;  %987 = vmax.xlane.f32.xlu0 %v2535_v43 }
 0x266   : > { %993 = vmax.xlane.f32.xlu1 %v2539_v3  ;;  %991 = vmax.xlane.f32.xlu0 %v2541_v46 }
 0x26a   : > { %997 = vmax.xlane.f32.xlu1 %v2545_v58  ;;  %995 = vmax.xlane.f32.xlu0 %v2547_v47 }
 0x26e   : > { %1001 = vmax.xlane.f32.xlu1 %v2551_v59  ;;  %999 = vmax.xlane.f32.xlu0 %v2553_v51 }
 0x272   : > { %1005 = vmax.xlane.f32.xlu1 %v2557_v44  ;;  %1003 = vmax.xlane.f32.xlu0 %v2559_v45 }
 0x276   : > { %1009 = vmax.xlane.f32.xlu1 %v2563_v13  ;;  %1007 = vmax.xlane.f32.xlu0 %v2565_v34 }
 0x27a   : > { %1013 = vmax.xlane.f32.xlu1 %v2569_v31  ;;  %1011 = vmax.xlane.f32.xlu0 %v2571_v48 }
 0x27e   : > { %1017 = vmax.xlane.f32.xlu1 %v2575_v40  ;;  %1015 = vmax.xlane.f32.xlu0 %v2577_v20 }
 0x282   : > { %1021 = vmax.xlane.f32.xlu1 %v2581_v1  ;;  %1019 = vmax.xlane.f32.xlu0 %v2583_v49 }
 0x286   : > { %1025 = vmax.xlane.f32.xlu1 %v2587_v5  ;;  %1023 = vmax.xlane.f32.xlu0 %v2589_v4 }
 0x28a   : > { %1029 = vmax.xlane.f32.xlu1 %v2593_v36  ;;  %1027 = vmax.xlane.f32.xlu0 %v2595_v22 }
 0x2bb   : > { %v940_v41 = vpop.xlane.xlu1 %939  ;;  %v936_v61 = vpop.xlane.xlu0 %935 }
 0x2bf   : > { %v942_v24 = vpop.xlane.xlu1 %941  ;;  %v938_v32 = vpop.xlane.xlu0 %937 }
 0x2c3   : > { %v946_v42 = vpop.xlane.xlu1 %945  ;;  %v944_v16 = vpop.xlane.xlu0 %943 }
 0x2c4   : > { %v1032_v17 = vmax.f32 %v938_v32, %v946_v42  ;;  %v1031_v62 = vmax.f32 %v936_v61, %v944_v16 }
 0x2c7   : > { %v950_v18 = vpop.xlane.xlu1 %949  ;;  %v948_v6 = vpop.xlane.xlu0 %947 }
 0x2c8   : > { %v1034_v26 = vmax.f32 %v942_v24, %v950_v18  ;;  %v1033_v0 = vmax.f32 %v940_v41, %v948_v6 }
 0x2cb   : > { %v954_v63 = vpop.xlane.xlu1 %953  ;;  %v952_v35 = vpop.xlane.xlu0 %951 }
 0x2cc   : > { %v1036_v46 = vmax.f32 %v1032_v17, %v954_v63  ;;  %v1035_v3 = vmax.f32 %v1031_v62, %v952_v35 }
 0x2cf   : > { %v958_v25 = vpop.xlane.xlu1 %957  ;;  %v956_v57 = vpop.xlane.xlu0 %955 }
 0x2d0   : > { %v1038_v15 = vmax.f32 %v1034_v26, %v958_v25  ;;  %v1037_v27 = vmax.f32 %v1033_v0, %v956_v57 }
 0x2d3   : > { %v962_v8 = vpop.xlane.xlu1 %961  ;;  %v960_v23 = vpop.xlane.xlu0 %959 }
 0x2d4   : > { %v1040_v50 = vmax.f32 %v1036_v46, %v962_v8  ;;  %v1039_v39 = vmax.f32 %v1035_v3, %v960_v23 }
 0x2d7   : > { %v966_v4 = vpop.xlane.xlu1 %965  ;;  %v964_v36 = vpop.xlane.xlu0 %963 }
 0x2d8   : > { %v1042_v38 = vmax.f32 %v1038_v15, %v966_v4  ;;  %v1041_v30 = vmax.f32 %v1037_v27, %v964_v36 }
 0x2db   : > { %v970_v5 = vpop.xlane.xlu1 %969  ;;  %v968_v22 = vpop.xlane.xlu0 %967 }
 0x2dc   : > { %v1044_v12 = vmax.f32 %v1040_v50, %v970_v5  ;;  %v1043_v19 = vmax.f32 %v1039_v39, %v968_v22 }
 0x2df   : > { %v974_v49 = vpop.xlane.xlu1 %973  ;;  %v972_v1 = vpop.xlane.xlu0 %971 }
 0x2e0   : > { %v1046_v28 = vmax.f32 %v1042_v38, %v974_v49  ;;  %v1045_v53 = vmax.f32 %v1041_v30, %v972_v1 }
 0x2e3   : > { %v978_v20 = vpop.xlane.xlu1 %977  ;;  %v976_v40 = vpop.xlane.xlu0 %975 }
 0x2e4   : > { %v1048_v7 = vmax.f32 %v1044_v12, %v978_v20  ;;  %v1047_v29 = vmax.f32 %v1043_v19, %v976_v40 }
 0x2e7   : > { %v982_v48 = vpop.xlane.xlu1 %981  ;;  %v980_v31 = vpop.xlane.xlu0 %979 }
 0x2e8   : > { %v1050_v24 = vmax.f32 %v1046_v28, %v982_v48  ;;  %v1049_v41 = vmax.f32 %v1045_v53, %v980_v31 }
 0x2eb   : > { %v986_v32 = vpop.xlane.xlu1 %985  ;;  %v984_v61 = vpop.xlane.xlu0 %983 }
 0x2ec   : > { %v1052_v17 = vmax.f32 %v1048_v7, %v986_v32  ;;  %v1051_v62 = vmax.f32 %v1047_v29, %v984_v61 }
 0x2ef   : > { %v990_v42 = vpop.xlane.xlu1 %989  ;;  %v988_v16 = vpop.xlane.xlu0 %987 }
 0x2f0   : > { %v1054_v26 = vmax.f32 %v1050_v24, %v990_v42  ;;  %v1053_v0 = vmax.f32 %v1049_v41, %v988_v16 }
 0x2f3   : > { %v994_v34 = vpop.xlane.xlu1 %993  ;;  %v992_v13 = vpop.xlane.xlu0 %991 }
 0x2f4   : > { %v1056_v46 = vmax.f32 %v1052_v17, %v994_v34  ;;  %v1055_v3 = vmax.f32 %v1051_v62, %v992_v13 }
 0x2f7   : > { %v998_v45 = vpop.xlane.xlu1 %997  ;;  %v996_v44 = vpop.xlane.xlu0 %995 }
 0x2f8   : > { %v1058_v15 = vmax.f32 %v1054_v26, %v998_v45  ;;  %v1057_v27 = vmax.f32 %v1053_v0, %v996_v44 }
 0x2fb   : > { %v1002_v51 = vpop.xlane.xlu1 %1001  ;;  %v1000_v59 = vpop.xlane.xlu0 %999 }
 0x2fc   : > { %v1060_v50 = vmax.f32 %v1056_v46, %v1002_v51  ;;  %v1059_v39 = vmax.f32 %v1055_v3, %v1000_v59  ;;  %v3116_v3 = vld [vmem:[#allocation34_spill] sm:$0xff] }
 0x2ff   : > { %v1006_v47 = vpop.xlane.xlu1 %1005  ;;  %v1004_v58 = vpop.xlane.xlu0 %1003 }
 0x300   : > { %v1062_v38 = vmax.f32 %v1058_v15, %v1006_v47  ;;  %v1061_v30 = vmax.f32 %v1057_v27, %v1004_v58  ;;  %v3118_v27 = vld [vmem:[#allocation36_spill] sm:$0xff] }
 0x303   : > { %v1010_v43 = vpop.xlane.xlu1 %1009  ;;  %v1008_v60 = vpop.xlane.xlu0 %1007 }
 0x304   : > { %v1064_v12 = vmax.f32 %v1060_v50, %v1010_v43  ;;  %v1063_v19 = vmax.f32 %v1059_v39, %v1008_v60  ;;  %v3117_v50 = vld [vmem:[#allocation35_spill] sm:$0xff] }
 0x307   : > { %v1014_v37 = vpop.xlane.xlu1 %1013  ;;  %v1012_v33 = vpop.xlane.xlu0 %1011 }
 0x308   : > { %v1066_v28 = vmax.f32 %v1062_v38, %v1014_v37  ;;  %v1065_v53 = vmax.f32 %v1061_v30, %v1012_v33  ;;  %v3119_v38 = vld [vmem:[#allocation37_spill] sm:$0xff] }
 0x30b   : > { %v1018_v63 = vpop.xlane.xlu1 %1017  ;;  %v1016_v35 = vpop.xlane.xlu0 %1015 }
 0x30c   : > { %v1068_v7 = vmax.f32 %v1064_v12, %v1018_v63  ;;  %v1067_v29 = vmax.f32 %v1063_v19, %v1016_v35 }
 0x30f   : > { %v1022_v5 = vpop.xlane.xlu1 %1021  ;;  %v1020_v22 = vpop.xlane.xlu0 %1019 }
 0x310   : > { %v1070_v31 = vmax.f32 %v1066_v28, %v1022_v5  ;;  %v1069_v48 = vmax.f32 %v1065_v53, %v1020_v22 }
 0x313   : > { %v1026_v40 = vpop.xlane.xlu1 %1025  ;;  %v1024_v20 = vpop.xlane.xlu0 %1023 }
 0x314   : > { %v1072_v34 = vmax.f32 %v1068_v7, %v1026_v40  ;;  %v1071_v13 = vmax.f32 %v1067_v29, %v1024_v20  ;;  %v3120_v20 = vld [vmem:[#allocation38_spill] sm:$0xff] }
 0x316   : > { %v1075_v51 = vmax.f32 %v1071_v13, %v1072_v34  ;;  %v3121_v34 = vld [vmem:[#allocation39_spill] sm:$0xff] }
 0x317   : > { %v1030_v59 = vpop.xlane.xlu1 %1029  ;;  %v1028_v1 = vpop.xlane.xlu0 %1027 }
 0x318   : > { %v1074_v49 = vmax.f32 %v1070_v31, %v1030_v59  ;;  %v1073_v45 = vmax.f32 %v1069_v48, %v1028_v1  ;;  %v3122_v59 = vld [vmem:[#allocation40_spill] sm:$0xff] }
 0x31a   : > { %v1076_v44 = vmax.f32 %v1073_v45, %v1074_v49  ;;  %v3123_v45 = vld [vmem:[#allocation41_spill] sm:$0xff] }
 0x31c   : > { %v1077_v43 = vmax.f32 %v1075_v51, %v1076_v44 }
 0x31e   : > { %v1078_v60 = vrot.slane %v1077_v43, 4 }
 0x320   : > { %v1079_v47 = vmax.f32 %v1077_v43, %v1078_v60 }
 0x322   : > { %v1080_v58 = vrot.slane %v1079_v47, 2 }
 0x324   : > { %v1081_v4 = vmax.f32 %v1079_v47, %v1080_v58  ;;  %v3124_v58 = vld [vmem:[#allocation42_spill] sm:$0xff] }
 0x326   : > { %v1082_v36 = vrot.slane %v1081_v4, 1 }
 0x328   : > { %v2599_v18 = vmax.f32 %v1081_v4, %v1082_v36 }
 0x32a   : > { %v1084_v33 = vsub.f32 %v2457_v14, %v2599_v18  ;;  %v1085_v37 = vsub.f32 %v2463_v54, %v2599_v18  ;;  %v1087_v6 = vsub.f32 %v2461_v52, %v2599_v18  ;;  %v1086_v25 = vsub.f32 %v2455_v2, %v2599_v18 }
 0x32b   : > { %v1089_v23 = vsub.f32 %v2467_v55, %v2599_v18  ;;  %v1088_v61 = vsub.f32 %v2469_v10, %v2599_v18  ;;  %v1091_v54 = vsub.f32 %v2473_v56, %v2599_v18  ;;  %v1090_v2 = vsub.f32 %v2475_v9, %v2599_v18  ;;  %v3114_v9 = vld [vmem:[#allocation32_spill] sm:$0xff] }
 0x32c   : > { %v1134_v57 = vmul.f32 1.442695, %v1085_v37  ;;  %v1132_v8 = vmul.f32 1.442695, %v1084_v33  ;;  %v1138_v32 = vmul.f32 1.442695, %v1087_v6  ;;  %v1093_v55 = vsub.f32 %v2479_v21, %v2599_v18 }
 0x32d   : > { %v1136_v14 = vmul.f32 1.442695, %v1086_v25  ;;  %v1142_v42 = vmul.f32 1.442695, %v1089_v23  ;;  %v1140_v52 = vmul.f32 1.442695, %v1088_v61  ;;  %v1092_v10 = vsub.f32 %v2481_v11, %v2599_v18 }
 0x32e   : > { %1662 = vpow2.f32 %v1134_v57  ;;  %v1146_v16 = vmul.f32 1.442695, %v1091_v54  ;;  %v1144_v17 = vmul.f32 1.442695, %v1090_v2  ;;  %v1095_v63 = vsub.f32 %v3114_v9, %v2599_v18  ;;  %v3115_v21 = vld [vmem:[#allocation33_spill] sm:$0xff]  ;;  %v3125_v33 = vld [vmem:[#allocation43_spill] sm:$0xff] }
 0x32f   : > { %1664 = vpow2.f32 %v1132_v8  ;;  %v1150_v35 = vmul.f32 1.442695, %v1093_v55  ;;  %v1094_v24 = vsub.f32 %v3115_v21, %v2599_v18  ;;  %v1148_v41 = vmul.f32 1.442695, %v1092_v10  ;;  %v3126_v8 = vld [vmem:[#allocation44_spill] sm:$0xff]  ;;  %v3127_v61 = vld [vmem:[#allocation45_spill] sm:$0xff] }
 0x330   : > { %1666 = vpow2.f32 %v1138_v32  ;;  %v1097_v26 = vsub.f32 %v3116_v3, %v2599_v18  ;;  %v1154_v0 = vmul.f32 1.442695, %v1095_v63  ;;  %v1096_v39 = vsub.f32 %v3117_v50, %v2599_v18  ;;  %v3129_v10 = vld [vmem:[#allocation47_spill] sm:$0xff]  ;;  %v3130_v21 = vld [vmem:[#allocation48_spill] sm:$0xff]  ;;  %v3131_v3 = vld [vmem:[#allocation49_spill] sm:$0xff] }
 0x331   : > { %1668 = vpow2.f32 %v1136_v14  ;;  %v1152_v5 = vmul.f32 1.442695, %v1094_v24  ;;  %v1099_v12 = vsub.f32 %v3118_v27, %v2599_v18  ;;  %v1098_v30 = vsub.f32 %v3119_v38, %v2599_v18 }
 0x332   : > { %1670 = vpow2.f32 %v1142_v42  ;;  %v1158_v19 = vmul.f32 1.442695, %v1097_v26  ;;  %v1156_v7 = vmul.f32 1.442695, %v1096_v39  ;;  %v1101_v28 = vsub.f32 %v3120_v20, %v2599_v18 }
 0x333   : > { %1672 = vpow2.f32 %v1140_v52  ;;  %v1162_v53 = vmul.f32 1.442695, %v1099_v12  ;;  %v1100_v13 = vsub.f32 %v3121_v34, %v2599_v18  ;;  %v1160_v31 = vmul.f32 1.442695, %v1098_v30  ;;  %v3128_v52 = vld [vmem:[#allocation46_spill] sm:$0xff] }
 0x334   : > { %1674 = vpow2.f32 %v1146_v16  ;;  %v1103_v1 = vsub.f32 %v3122_v59, %v2599_v18  ;;  %v1166_v49 = vmul.f32 1.442695, %v1101_v28  ;;  %v1102_v44 = vsub.f32 %v3123_v45, %v2599_v18  ;;  %v3134_v28 = vld [vmem:[#allocation52_spill] sm:$0xff]  ;;  %v3136_v45 = vld [vmem:[#allocation54_spill] sm:$0xff] }
 0x335   : > { %1676 = vpow2.f32 %v1144_v17  ;;  %v1164_v43 = vmul.f32 1.442695, %v1100_v13  ;;  %v1105_v4 = vsub.f32 %v3124_v58, %v2599_v18  ;;  %v1104_v37 = vsub.f32 %v3125_v33, %v2599_v18  ;;  %v3135_v13 = vld [vmem:[#allocation53_spill] sm:$0xff]  ;;  %v3137_v58 = vld [vmem:[#allocation55_spill] sm:$0xff] }
 0x336   : > { %1678 = vpow2.f32 %v1150_v35  ;;  %v1170_v36 = vmul.f32 1.442695, %v1103_v1  ;;  %v1168_v6 = vmul.f32 1.442695, %v1102_v44  ;;  %v1107_v23 = vsub.f32 %v3126_v8, %v2599_v18 }
 0x337   : > { %1680 = vpow2.f32 %v1148_v41  ;;  %v1174_v32 = vmul.f32 1.442695, %v1105_v4  ;;  %v1106_v14 = vsub.f32 %v3127_v61, %v2599_v18  ;;  %v1172_v54 = vmul.f32 1.442695, %v1104_v37 }
 0x338   : > { %v2621_v62 = vpop.eup %1662  ;;  %1682 = vpow2.f32 %v1154_v0  ;;  %v1109_v55 = vsub.f32 %v3128_v52, %v2599_v18  ;;  %v1178_v16 = vmul.f32 1.442695, %v1107_v23  ;;  %v1108_v17 = vsub.f32 %v3129_v10, %v2599_v18 }
 0x339   : > { %v2623_v56 = vpop.eup %1664  ;;  %1230 = vadd.xlane.f32.xlu1 %v2621_v62  ;;  %1684 = vpow2.f32 %v1152_v5  ;;  %v1176_v9 = vmul.f32 1.442695, %v1106_v14  ;;  %v1111_v24 = vsub.f32 %v3130_v21, %v2599_v18  ;;  %v1110_v26 = vsub.f32 %v3131_v3, %v2599_v18  ;;  %v3132_v5 = vld [vmem:[#allocation50_spill] sm:$0xff]  ;;  %v3142_v3 = vld [vmem:[#allocation60_spill] sm:$0xff] }
 0x33a   : > { %1228 = vadd.xlane.f32.xlu0 %v2623_v56  ;;  %v2631_v11 = vpop.eup %1666  ;;  %1686 = vpow2.f32 %v1158_v19  ;;  %v1182_v41 = vmul.f32 1.442695, %v1109_v55  ;;  %v1180_v0 = vmul.f32 1.442695, %v1108_v17  ;;  %v1113_v27 = vsub.f32 %v3132_v5, %v2599_v18  ;;  %v3133_v19 = vld [vmem:[#allocation51_spill] sm:$0xff]  ;;  %v3140_v55 = vld [vmem:[#allocation58_spill] sm:$0xff] }
 0x33b   : > { %v2633_v46 = vpop.eup %1668  ;;  %1688 = vpow2.f32 %v1156_v7  ;;  %v1186_v12 = vmul.f32 1.442695, %v1111_v24  ;;  %v1112_v38 = vsub.f32 %v3133_v19, %v2599_v18  ;;  %v1184_v30 = vmul.f32 1.442695, %v1110_v26  ;;  %v3141_v17 = vld [vmem:[#allocation59_spill] sm:$0xff]  ;;  %v3143_v5 = vld [vmem:[#allocation61_spill] sm:$0xff] }
 0x33c   : > { %v2641_v22 = vpop.eup %1670  ;;  %1690 = vpow2.f32 %v1162_v53  ;;  %v1115_v53 = vsub.f32 %v3134_v28, %v2599_v18  ;;  %v1190_v34 = vmul.f32 1.442695, %v1113_v27  ;;  %v1117_v44 = vsub.f32 %v3136_v45, %v2599_v18 }
 0x33d   : > { %1234 = vadd.xlane.f32.xlu1 %v2631_v11  ;;  %v2643_v15 = vpop.eup %1672  ;;  %1692 = vpow2.f32 %v1160_v31  ;;  %v1114_v31 = vsub.f32 %v3135_v13, %v2599_v18  ;;  %v1188_v59 = vmul.f32 1.442695, %v1112_v38  ;;  %v1116_v4 = vsub.f32 %v3137_v58, %v2599_v18 }
 0x33e   : > { %1232 = vadd.xlane.f32.xlu0 %v2633_v46  ;;  %v2651_v29 = vpop.eup %1674  ;;  %1694 = vpow2.f32 %v1166_v49  ;;  %v1198_v23 = vmul.f32 1.442695, %v1117_v44  ;;  %v1123_v26 = vsub.f32 %v3142_v3, %v2599_v18  ;;  %v1122_v27 = vsub.f32 %v3143_v5, %v2599_v18  ;;  %v3146_v44 = vld [vmem:[#allocation64_spill] sm:$0xff] }
 0x33f   : > { %v2653_v40 = vpop.eup %1676  ;;  %1696 = vpow2.f32 %v1164_v43  ;;  %v1194_v43 = vmul.f32 1.442695, %v1115_v53  ;;  %v1196_v14 = vmul.f32 1.442695, %v1116_v4  ;;  %v3147_v4 = vld [vmem:[#allocation65_spill] sm:$0xff] }
 0x340   : > { %v2661_v48 = vpop.eup %1678  ;;  %1698 = vpow2.f32 %v1170_v36  ;;  %v1192_v36 = vmul.f32 1.442695, %v1114_v31  ;;  %v1210_v53 = vmul.f32 1.442695, %v1123_v26  ;;  %v1208_v31 = vmul.f32 1.442695, %v1122_v27 }
 0x341   : > { %1238 = vadd.xlane.f32.xlu1 %v2641_v22  ;;  %v2663_v51 = vpop.eup %1680  ;;  %1700 = vpow2.f32 %v1168_v6  ;;  %v3138_v6 = vld [vmem:[#allocation56_spill] sm:$0xff] }
 0x342   : > { %1236 = vadd.xlane.f32.xlu0 %v2643_v15  ;;  %v2671_v60 = vpop.eup %1682  ;;  %1702 = vpow2.f32 %v1174_v32  ;;  %v1119_v8 = vsub.f32 %v3138_v6, %v2599_v18  ;;  %v3139_v32 = vld [vmem:[#allocation57_spill] sm:$0xff] }
 0x343   : > { %v2673_v47 = vpop.eup %1684  ;;  %1704 = vpow2.f32 %v1172_v54  ;;  %v1118_v61 = vsub.f32 %v3139_v32, %v2599_v18  ;;  %v3148_v32 = vld [vmem:[#allocation66_spill] sm:$0xff] }
 0x344   : > { %v2681_v25 = vpop.eup %1686  ;;  %1706 = vpow2.f32 %v1178_v16  ;;  %v1121_v16 = vsub.f32 %v3140_v55, %v2599_v18  ;;  %v1202_v10 = vmul.f32 1.442695, %v1119_v8  ;;  %v3149_v55 = vld [vmem:[#allocation67_spill] sm:$0xff] }
 0x345   : > { %1242 = vadd.xlane.f32.xlu1 %v2651_v29  ;;  %v2683_v57 = vpop.eup %1688  ;;  %1708 = vpow2.f32 %v1176_v9  ;;  %v1120_v9 = vsub.f32 %v3141_v17, %v2599_v18  ;;  %v1200_v21 = vmul.f32 1.442695, %v1118_v61  ;;  %v1129_v61 = vsub.f32 %v3148_v32, %v2599_v18 }
 0x346   : > { %1240 = vadd.xlane.f32.xlu0 %v2653_v40  ;;  %v2691_v42 = vpop.eup %1690  ;;  %1710 = vpow2.f32 %v1182_v41 }
 0x347   : > { %v2693_v2 = vpop.eup %1692  ;;  %1712 = vpow2.f32 %v1180_v0  ;;  %v1206_v0 = vmul.f32 1.442695, %v1121_v16  ;;  %v1128_v16 = vsub.f32 %v3149_v55, %v2599_v18  ;;  %v1222_v26 = vmul.f32 1.442695, %v1129_v61 }
 0x348   : > { %v2701_v63 = vpop.eup %1694  ;;  %1714 = vpow2.f32 %v1186_v12  ;;  %v1204_v12 = vmul.f32 1.442695, %v1120_v9 }
 0x349   : > { %1246 = vadd.xlane.f32.xlu1 %v2661_v48  ;;  %v2703_v35 = vpop.eup %1696  ;;  %1716 = vpow2.f32 %v1184_v30  ;;  %v3144_v30 = vld [vmem:[#allocation62_spill] sm:$0xff]  ;;  %v1220_v27 = vmul.f32 1.442695, %v1128_v16 }
 0x34a   : > { %1244 = vadd.xlane.f32.xlu0 %v2663_v51  ;;  %v2711_v50 = vpop.eup %1698  ;;  %1718 = vpow2.f32 %v1190_v34  ;;  %v1125_v28 = vsub.f32 %v3144_v30, %v2599_v18  ;;  %v3145_v34 = vld [vmem:[#allocation63_spill] sm:$0xff] }
 0x34b   : > { %v2713_v39 = vpop.eup %1700  ;;  %1720 = vpow2.f32 %v1188_v59  ;;  %v1124_v13 = vsub.f32 %v3145_v34, %v2599_v18 }
 0x34c   : > { %v2721_v7 = vpop.eup %1702  ;;  %1722 = vpow2.f32 %v1194_v43  ;;  %v1127_v43 = vsub.f32 %v3146_v44, %v2599_v18  ;;  %v1214_v58 = vmul.f32 1.442695, %v1125_v28 }
 0x34d   : > { %1250 = vadd.xlane.f32.xlu1 %v2671_v60  ;;  %v2723_v20 = vpop.eup %1704  ;;  %1724 = vpow2.f32 %v1192_v36  ;;  %v1126_v36 = vsub.f32 %v3147_v4, %v2599_v18  ;;  %v1212_v6 = vmul.f32 1.442695, %v1124_v13 }
 0x34e   : > { %1248 = vadd.xlane.f32.xlu0 %v2673_v47  ;;  %v2731_v1 = vpop.eup %1706  ;;  %1726 = vpow2.f32 %v1198_v23 }
 0x34f   : > { %v2733_v49 = vpop.eup %1708  ;;  %1728 = vpow2.f32 %v1196_v14  ;;  %v1218_v14 = vmul.f32 1.442695, %v1127_v43 }
 0x350   : > { %v2741_v33 = vpop.eup %1710  ;;  %1730 = vpow2.f32 %v1202_v10  ;;  %v1216_v10 = vmul.f32 1.442695, %v1126_v36 }
 0x351   : > { %1254 = vadd.xlane.f32.xlu1 %v2681_v25  ;;  %v2743_v37 = vpop.eup %1712  ;;  %1732 = vpow2.f32 %v1200_v21  ;;  %v3150_v21 = vld [vmem:[#allocation68_spill] sm:$0xff] }
 0x352   : > { %1252 = vadd.xlane.f32.xlu0 %v2683_v57  ;;  %v2751_v54 = vpop.eup %1714  ;;  %1734 = vpow2.f32 %v1206_v0  ;;  %v1131_v3 = vsub.f32 %v3150_v21, %v2599_v18  ;;  %v3151_v0 = vld [vmem:[#allocation69_spill] sm:$0xff] }
 0x353   : > { %v2753_v52 = vpop.eup %1716  ;;  %1736 = vpow2.f32 %v1204_v12  ;;  %v1130_v5 = vsub.f32 %v3151_v0, %v2599_v18 }
 0x354   : > { %v2761_v24 = vpop.eup %1718  ;;  %1738 = vpow2.f32 %v1210_v53  ;;  %v1226_v28 = vmul.f32 1.442695, %v1131_v3 }
 0x355   : > { %1258 = vadd.xlane.f32.xlu1 %v2691_v42  ;;  %v2763_v41 = vpop.eup %1720  ;;  %1740 = vpow2.f32 %v1208_v31  ;;  %v1224_v53 = vmul.f32 1.442695, %v1130_v5 }
 0x356   : > { %1256 = vadd.xlane.f32.xlu0 %v2693_v2  ;;  %v2771_v19 = vpop.eup %1722  ;;  %1742 = vpow2.f32 %v1214_v58 }
 0x357   : > { %v2773_v38 = vpop.eup %1724  ;;  %1744 = vpow2.f32 %v1212_v6 }
 0x358   : > { %v2781_v59 = vpop.eup %1726  ;;  %1746 = vpow2.f32 %v1218_v14 }
 0x359   : > { %1262 = vadd.xlane.f32.xlu1 %v2701_v63  ;;  %v2783_v45 = vpop.eup %1728  ;;  %1748 = vpow2.f32 %v1216_v10 }
 0x35a   : > { %1260 = vadd.xlane.f32.xlu0 %v2703_v35  ;;  %v2791_v8 = vpop.eup %1730  ;;  %1750 = vpow2.f32 %v1222_v26 }
 0x35b   : > { %v2793_v23 = vpop.eup %1732  ;;  %1752 = vpow2.f32 %v1220_v27 }
 0x35c   : > { %v2801_v17 = vpop.eup %1734  ;;  %1754 = vpow2.f32 %v1226_v28 }
 0x35d   : > { %1266 = vadd.xlane.f32.xlu1 %v2711_v50  ;;  %v2803_v9 = vpop.eup %1736  ;;  %1756 = vpow2.f32 %v1224_v53 }
 0x35e   : > { %1264 = vadd.xlane.f32.xlu0 %v2713_v39  ;;  %v2811_v12 = vpop.eup %1738 }
 0x35f   : > { %v2813_v30 = vpop.eup %1740 }
 0x360   : > { %v2817_v34 = vpop.eup %1742 }
 0x361   : > { %1270 = vadd.xlane.f32.xlu1 %v2721_v7  ;;  %3152 = vst [vmem:[#allocation32_spill] sm:$0xff] %v2817_v34  ;;  %v2819_v13 = vpop.eup %1744 }
 0x362   : > { %1268 = vadd.xlane.f32.xlu0 %v2723_v20  ;;  %v2823_v18 = vpop.eup %1746 }
 0x363   : > { %3153 = vst [vmem:[#allocation33_spill] sm:$0xff] %v2823_v18  ;;  %v2825_v31 = vpop.eup %1748 }
 0x364   : > { %3154 = vst [vmem:[#allocation34_spill] sm:$0xff] %v2825_v31  ;;  %v2829_v44 = vpop.eup %1750 }
 0x365   : > { %1274 = vadd.xlane.f32.xlu1 %v2731_v1  ;;  %3155 = vst [vmem:[#allocation35_spill] sm:$0xff] %v2829_v44  ;;  %v2831_v43 = vpop.eup %1752 }
 0x366   : > { %1272 = vadd.xlane.f32.xlu0 %v2733_v49  ;;  %3156 = vst [vmem:[#allocation36_spill] sm:$0xff] %v2831_v43  ;;  %v2835_v58 = vpop.eup %1754 }
 0x367   : > { %3157 = vst [vmem:[#allocation37_spill] sm:$0xff] %v2835_v58  ;;  %v2837_v4 = vpop.eup %1756 }
 0x368   : > { %3158 = vst [vmem:[#allocation38_spill] sm:$0xff] %v2837_v4 }
 0x369   : > { %1278 = vadd.xlane.f32.xlu1 %v2741_v33 }
 0x36a   : > { %1276 = vadd.xlane.f32.xlu0 %v2743_v37 }
 0x36d   : > { %1282 = vadd.xlane.f32.xlu1 %v2751_v54 }
 0x36e   : > { %1280 = vadd.xlane.f32.xlu0 %v2753_v52 }
 0x371   : > { %1286 = vadd.xlane.f32.xlu1 %v2761_v24 }
 0x372   : > { %1284 = vadd.xlane.f32.xlu0 %v2763_v41 }
 0x375   : > { %1290 = vadd.xlane.f32.xlu1 %v2771_v19 }
 0x376   : > { %1288 = vadd.xlane.f32.xlu0 %v2773_v38 }
 0x379   : > { %1294 = vadd.xlane.f32.xlu1 %v2781_v59 }
 0x37a   : > { %1292 = vadd.xlane.f32.xlu0 %v2783_v45 }
 0x37d   : > { %1298 = vadd.xlane.f32.xlu1 %v2791_v8 }
 0x37e   : > { %1296 = vadd.xlane.f32.xlu0 %v2793_v23 }
 0x381   : > { %1302 = vadd.xlane.f32.xlu1 %v2801_v17 }
 0x382   : > { %1300 = vadd.xlane.f32.xlu0 %v2803_v9 }
 0x385   : > { %1306 = vadd.xlane.f32.xlu1 %v2811_v12 }
 0x386   : > { %1304 = vadd.xlane.f32.xlu0 %v2813_v30 }
 0x389   : > { %1310 = vadd.xlane.f32.xlu1 %v2817_v34 }
 0x38a   : > { %1308 = vadd.xlane.f32.xlu0 %v2819_v13 }
 0x38d   : > { %1314 = vadd.xlane.f32.xlu1 %v2823_v18 }
 0x38e   : > { %1312 = vadd.xlane.f32.xlu0 %v2825_v31 }
 0x391   : > { %1318 = vadd.xlane.f32.xlu1 %v2829_v44 }
 0x392   : > { %1316 = vadd.xlane.f32.xlu0 %v2831_v43 }
 0x395   : > { %1322 = vadd.xlane.f32.xlu1 %v2835_v58 }
 0x396   : > { %1320 = vadd.xlane.f32.xlu0 %v2837_v4 }
 0x3c6   : > { %v1231_v36 = vpop.xlane.xlu1 %1230 }
 0x3c7   : > { %v1229_v6 = vpop.xlane.xlu0 %1228 }
 0x3c8   : > { %v1324_v32 = vadd.f32 %v1231_v36, %v1229_v6 }
 0x3ca   : > { %v1235_v61 = vpop.xlane.xlu1 %1234 }
 0x3cb   : > { %v1233_v14 = vpop.xlane.xlu0 %1232 }
 0x3cc   : > { %v1325_v55 = vadd.f32 %v1324_v32, %v1233_v14 }
 0x3ce   : > { %v1239_v16 = vpop.xlane.xlu1 %1238  ;;  %v1326_v10 = vadd.f32 %v1325_v55, %v1235_v61 }
 0x3cf   : > { %v1237_v21 = vpop.xlane.xlu0 %1236 }
 0x3d0   : > { %v1327_v3 = vadd.f32 %v1326_v10, %v1237_v21 }
 0x3d2   : > { %v1243_v26 = vpop.xlane.xlu1 %1242  ;;  %v1328_v0 = vadd.f32 %v1327_v3, %v1239_v16 }
 0x3d3   : > { %v1241_v5 = vpop.xlane.xlu0 %1240 }
 0x3d4   : > { %v1329_v27 = vadd.f32 %v1328_v0, %v1241_v5 }
 0x3d6   : > { %v1247_v28 = vpop.xlane.xlu1 %1246  ;;  %v1330_v53 = vadd.f32 %v1329_v27, %v1243_v26 }
 0x3d7   : > { %v1245_v44 = vpop.xlane.xlu0 %1244 }
 0x3d8   : > { %v1331_v58 = vadd.f32 %v1330_v53, %v1245_v44 }
 0x3da   : > { %v1251_v43 = vpop.xlane.xlu1 %1250  ;;  %v1332_v4 = vadd.f32 %v1331_v58, %v1247_v28 }
 0x3db   : > { %v1249_v18 = vpop.xlane.xlu0 %1248 }
 0x3dc   : > { %v1333_v31 = vadd.f32 %v1332_v4, %v1249_v18 }
 0x3de   : > { %v1255_v36 = vpop.xlane.xlu1 %1254  ;;  %v1334_v6 = vadd.f32 %v1333_v31, %v1251_v43 }
 0x3df   : > { %v1253_v34 = vpop.xlane.xlu0 %1252 }
 0x3e0   : > { %v1335_v32 = vadd.f32 %v1334_v6, %v1253_v34 }
 0x3e2   : > { %v1259_v14 = vpop.xlane.xlu1 %1258  ;;  %v1336_v61 = vadd.f32 %v1335_v32, %v1255_v36 }
 0x3e3   : > { %v1257_v55 = vpop.xlane.xlu0 %1256 }
 0x3e4   : > { %v1337_v10 = vadd.f32 %v1336_v61, %v1257_v55 }
 0x3e6   : > { %v1263_v21 = vpop.xlane.xlu1 %1262  ;;  %v1338_v16 = vadd.f32 %v1337_v10, %v1259_v14 }
 0x3e7   : > { %v1261_v3 = vpop.xlane.xlu0 %1260 }
 0x3e8   : > { %v1339_v0 = vadd.f32 %v1338_v16, %v1261_v3 }
 0x3ea   : > { %v1267_v5 = vpop.xlane.xlu1 %1266  ;;  %v1340_v26 = vadd.f32 %v1339_v0, %v1263_v21 }
 0x3eb   : > { %v1265_v27 = vpop.xlane.xlu0 %1264 }
 0x3ec   : > { %v1341_v44 = vadd.f32 %v1340_v26, %v1265_v27 }
 0x3ee   : > { %v1271_v53 = vpop.xlane.xlu1 %1270  ;;  %v1342_v58 = vadd.f32 %v1341_v44, %v1267_v5 }
 0x3ef   : > { %v1269_v28 = vpop.xlane.xlu0 %1268 }
 0x3f0   : > { %v1343_v18 = vadd.f32 %v1342_v58, %v1269_v28 }
 0x3f2   : > { %v1275_v4 = vpop.xlane.xlu1 %1274  ;;  %v1344_v31 = vadd.f32 %v1343_v18, %v1271_v53 }
 0x3f3   : > { %v1273_v43 = vpop.xlane.xlu0 %1272 }
 0x3f4   : > { %v1345_v34 = vadd.f32 %v1344_v31, %v1273_v43 }
 0x3f6   : > { %v1279_v6 = vpop.xlane.xlu1 %1278  ;;  %v1346_v36 = vadd.f32 %v1345_v34, %v1275_v4 }
 0x3f7   : > { %v1277_v32 = vpop.xlane.xlu0 %1276 }
 0x3f8   : > { %v1347_v61 = vadd.f32 %v1346_v36, %v1277_v32 }
 0x3fa   : > { %v1283_v55 = vpop.xlane.xlu1 %1282  ;;  %v1348_v14 = vadd.f32 %v1347_v61, %v1279_v6 }
 0x3fb   : > { %v1281_v10 = vpop.xlane.xlu0 %1280 }
 0x3fc   : > { %v1349_v16 = vadd.f32 %v1348_v14, %v1281_v10 }
 0x3fe   : > { %v1287_v3 = vpop.xlane.xlu1 %1286  ;;  %v1350_v21 = vadd.f32 %v1349_v16, %v1283_v55 }
 0x3ff   : > { %v1285_v0 = vpop.xlane.xlu0 %1284 }
 0x400   : > { %v1351_v26 = vadd.f32 %v1350_v21, %v1285_v0 }
 0x402   : > { %v1291_v27 = vpop.xlane.xlu1 %1290  ;;  %v1352_v5 = vadd.f32 %v1351_v26, %v1287_v3 }
 0x403   : > { %v1289_v44 = vpop.xlane.xlu0 %1288 }
 0x404   : > { %v1353_v58 = vadd.f32 %v1352_v5, %v1289_v44 }
 0x406   : > { %v1295_v28 = vpop.xlane.xlu1 %1294  ;;  %v1354_v53 = vadd.f32 %v1353_v58, %v1291_v27 }
 0x407   : > { %v1293_v18 = vpop.xlane.xlu0 %1292 }
 0x408   : > { %v1355_v31 = vadd.f32 %v1354_v53, %v1293_v18 }
 0x40a   : > { %v1299_v43 = vpop.xlane.xlu1 %1298  ;;  %v1356_v4 = vadd.f32 %v1355_v31, %v1295_v28 }
 0x40b   : > { %v1297_v34 = vpop.xlane.xlu0 %1296 }
 0x40c   : > { %v1357_v36 = vadd.f32 %v1356_v4, %v1297_v34 }
 0x40e   : > { %v1303_v32 = vpop.xlane.xlu1 %1302  ;;  %v1358_v6 = vadd.f32 %v1357_v36, %v1299_v43 }
 0x40f   : > { %v1301_v61 = vpop.xlane.xlu0 %1300 }
 0x410   : > { %v1359_v14 = vadd.f32 %v1358_v6, %v1301_v61 }
 0x412   : > { %v1307_v10 = vpop.xlane.xlu1 %1306  ;;  %v1360_v55 = vadd.f32 %v1359_v14, %v1303_v32 }
 0x413   : > { %v1305_v16 = vpop.xlane.xlu0 %1304 }
 0x414   : > { %v1361_v21 = vadd.f32 %v1360_v55, %v1305_v16 }
 0x416   : > { %v1311_v0 = vpop.xlane.xlu1 %1310  ;;  %v1362_v3 = vadd.f32 %v1361_v21, %v1307_v10 }
 0x417   : > { %v1309_v26 = vpop.xlane.xlu0 %1308 }
 0x418   : > { %v1363_v5 = vadd.f32 %v1362_v3, %v1309_v26 }
 0x41a   : > { %v1315_v44 = vpop.xlane.xlu1 %1314  ;;  %v1364_v27 = vadd.f32 %v1363_v5, %v1311_v0 }
 0x41b   : > { %v1313_v58 = vpop.xlane.xlu0 %1312 }
 0x41c   : > { %v1365_v53 = vadd.f32 %v1364_v27, %v1313_v58 }
 0x41e   : > { %v1366_v18 = vadd.f32 %v1365_v53, %v1315_v44  ;;  %v1319_v28 = vpop.xlane.xlu1 %1318 }
 0x41f   : > { %v1317_v31 = vpop.xlane.xlu0 %1316 }
 0x420   : > { %v1367_v4 = vadd.f32 %v1366_v18, %v1317_v31  ;;  %v3163_v31 = vld [vmem:[#allocation35_spill] sm:$0xff] }
 0x422   : > { %v1368_v34 = vadd.f32 %v1367_v4, %v1319_v28  ;;  %v1323_v6 = vpop.xlane.xlu1 %1322 }
 0x423   : > { %v1321_v43 = vpop.xlane.xlu0 %1320 }
 0x424   : > { %v1369_v36 = vadd.f32 %v1368_v34, %v1321_v43  ;;  %v3165_v43 = vld [vmem:[#allocation37_spill] sm:$0xff] }
 0x426   : > { %v1370_v61 = vadd.f32 %v1369_v36, %v1323_v6 }
 0x428   : > { %v1371_v32 = vrot.slane %v1370_v61, 4 }
 0x42a   : > { %v1372_v14 = vadd.f32 %v1371_v32, %v1370_v61 }
 0x42c   : > { %v1373_v55 = vrot.slane %v1372_v14, 2 }
 0x42e   : > { %v1374_v16 = vadd.f32 %v1373_v55, %v1372_v14 }
 0x430   : > { %v1375_v10 = vrot.slane %v1374_v16, 1 }
 0x432   : > { %v1376_v21 = vadd.f32 %v1375_v10, %v1374_v16 }
 0x434   : > { %1758 = vrcp.f32 %v1376_v21 }
 0x43e   : > { %v2841_v3 = vpop.eup %1758 }
 0x43f   : > { %v1378_v0 = vmul.f32 %v2841_v3, %v2623_v56  ;;  %v1379_v26 = vmul.f32 %v2841_v3, %v2621_v62  ;;  %v1380_v5 = vmul.f32 %v2841_v3, %v2633_v46  ;;  %v1381_v44 = vmul.f32 %v2841_v3, %v2631_v11 }
 0x440   : > { %v1382_v27 = vmul.f32 %v2841_v3, %v2643_v15  ;;  %v1383_v58 = vmul.f32 %v2841_v3, %v2641_v22  ;;  %v1384_v53 = vmul.f32 %v2841_v3, %v2653_v40  ;;  %v1385_v56 = vmul.f32 %v2841_v3, %v2651_v29 }
 0x441   : > { %v1386_v62 = vmul.f32 %v2841_v3, %v2663_v51  ;;  %v1387_v46 = vmul.f32 %v2841_v3, %v2661_v48  ;;  %v1388_v11 = vmul.f32 %v2841_v3, %v2673_v47  ;;  %v1389_v15 = vmul.f32 %v2841_v3, %v2671_v60  ;;  %1426 = vst [vmem:[#allocation9] sm:$0xff] %v1378_v0 }
 0x442   : > { %1427 = vst [vmem:[#allocation9 + $0x8] sm:$0xff] %v1379_v26  ;;  %1428 = vst [vmem:[#allocation9 + $0x10] sm:$0xff] %v1380_v5  ;;  %v1390_v22 = vmul.f32 %v2841_v3, %v2683_v57  ;;  %v1391_v29 = vmul.f32 %v2841_v3, %v2681_v25  ;;  %v1392_v40 = vmul.f32 %v2841_v3, %v2693_v2 }
 0x443   : > { %1429 = vst [vmem:[#allocation9 + $0x18] sm:$0xff] %v1381_v44  ;;  %v1393_v48 = vmul.f32 %v2841_v3, %v2691_v42  ;;  %1430 = vst [vmem:[#allocation9 + $0x20] sm:$0xff] %v1382_v27  ;;  %v1394_v51 = vmul.f32 %v2841_v3, %v2703_v35  ;;  %v1395_v60 = vmul.f32 %v2841_v3, %v2701_v63 }
 0x444   : > { %1431 = vst [vmem:[#allocation9 + $0x28] sm:$0xff] %v1383_v58  ;;  %1432 = vst [vmem:[#allocation9 + $0x30] sm:$0xff] %v1384_v53  ;;  %v1396_v47 = vmul.f32 %v2841_v3, %v2713_v39  ;;  %v1397_v25 = vmul.f32 %v2841_v3, %v2711_v50  ;;  %v1398_v57 = vmul.f32 %v2841_v3, %v2723_v20 }
 0x445   : > { %1433 = vst [vmem:[#allocation9 + $0x38] sm:$0xff] %v1385_v56  ;;  %1434 = vst [vmem:[#allocation9 + $0x40] sm:$0xff] %v1386_v62  ;;  %v1399_v42 = vmul.f32 %v2841_v3, %v2721_v7  ;;  %v1400_v2 = vmul.f32 %v2841_v3, %v2733_v49  ;;  %v1401_v63 = vmul.f32 %v2841_v3, %v2731_v1 }
 0x446   : > { %1435 = vst [vmem:[#allocation9 + $0x48] sm:$0xff] %v1387_v46  ;;  %1436 = vst [vmem:[#allocation9 + $0x50] sm:$0xff] %v1388_v11  ;;  %v1402_v35 = vmul.f32 %v2841_v3, %v2743_v37  ;;  %v1403_v50 = vmul.f32 %v2841_v3, %v2741_v33  ;;  %v1404_v39 = vmul.f32 %v2841_v3, %v2753_v52 }
 0x447   : > { %1437 = vst [vmem:[#allocation9 + $0x58] sm:$0xff] %v1389_v15  ;;  %1438 = vst [vmem:[#allocation9 + $0x60] sm:$0xff] %v1390_v22  ;;  %v1405_v7 = vmul.f32 %v2841_v3, %v2751_v54  ;;  %v1406_v20 = vmul.f32 %v2841_v3, %v2763_v41  ;;  %v1407_v1 = vmul.f32 %v2841_v3, %v2761_v24 }
 0x448   : > { %1439 = vst [vmem:[#allocation9 + $0x68] sm:$0xff] %v1391_v29  ;;  %1440 = vst [vmem:[#allocation9 + $0x70] sm:$0xff] %v1392_v40  ;;  %v1408_v49 = vmul.f32 %v2841_v3, %v2773_v38  ;;  %v1409_v33 = vmul.f32 %v2841_v3, %v2771_v19  ;;  %v1410_v37 = vmul.f32 %v2841_v3, %v2783_v45 }
 0x449   : > { %1441 = vst [vmem:[#allocation9 + $0x78] sm:$0xff] %v1393_v48  ;;  %1442 = vst [vmem:[#allocation9 + $0x80] sm:$0xff] %v1394_v51  ;;  %v1411_v54 = vmul.f32 %v2841_v3, %v2781_v59  ;;  %v1412_v52 = vmul.f32 %v2841_v3, %v2793_v23  ;;  %v1413_v24 = vmul.f32 %v2841_v3, %v2791_v8  ;;  %v3159_v8 = vld [vmem:[#allocation32_spill] sm:$0xff] }
 0x44a   : > { %1443 = vst [vmem:[#allocation9 + $0x88] sm:$0xff] %v1395_v60  ;;  %1444 = vst [vmem:[#allocation9 + $0x90] sm:$0xff] %v1396_v47  ;;  %v1414_v41 = vmul.f32 %v2841_v3, %v2803_v9  ;;  %v1415_v19 = vmul.f32 %v2841_v3, %v2801_v17  ;;  %v1416_v38 = vmul.f32 %v2841_v3, %v2813_v30  ;;  %v3160_v9 = vld [vmem:[#allocation34_spill] sm:$0xff]  ;;  %v3161_v17 = vld [vmem:[#allocation33_spill] sm:$0xff] }
 0x44b   : > { %1445 = vst [vmem:[#allocation9 + $0x98] sm:$0xff] %v1397_v25  ;;  %1446 = vst [vmem:[#allocation9 + $0xa0] sm:$0xff] %v1398_v57  ;;  %v1417_v59 = vmul.f32 %v2841_v3, %v2811_v12  ;;  %v1418_v45 = vmul.f32 %v2841_v3, %v2819_v13  ;;  %v1419_v23 = vmul.f32 %v2841_v3, %v3159_v8  ;;  %v3162_v12 = vld [vmem:[#allocation36_spill] sm:$0xff]  ;;  %v3164_v13 = vld [vmem:[#allocation38_spill] sm:$0xff] }
 0x44c   : > { %1447 = vst [vmem:[#allocation9 + $0xa8] sm:$0xff] %v1399_v42  ;;  %1448 = vst [vmem:[#allocation9 + $0xb0] sm:$0xff] %v1400_v2  ;;  %v1420_v18 = vmul.f32 %v2841_v3, %v3160_v9  ;;  %v1421_v28 = vmul.f32 %v2841_v3, %v3161_v17  ;;  %v1422_v30 = vmul.f32 %v2841_v3, %v3162_v12 }
 0x44d   : > { %1449 = vst [vmem:[#allocation9 + $0xb8] sm:$0xff] %v1401_v63  ;;  %1450 = vst [vmem:[#allocation9 + $0xc0] sm:$0xff] %v1402_v35  ;;  %v1423_v4 = vmul.f32 %v2841_v3, %v3163_v31  ;;  %v1424_v34 = vmul.f32 %v2841_v3, %v3164_v13  ;;  %v1425_v36 = vmul.f32 %v2841_v3, %v3165_v43 }
 0x44e   : > { %1451 = vst [vmem:[#allocation9 + $0xc8] sm:$0xff] %v1403_v50  ;;  %1452 = vst [vmem:[#allocation9 + $0xd0] sm:$0xff] %v1404_v39 }
 0x44f   : > { %1453 = vst [vmem:[#allocation9 + $0xd8] sm:$0xff] %v1405_v7  ;;  %1454 = vst [vmem:[#allocation9 + $0xe0] sm:$0xff] %v1406_v20 }
 0x450   : > { %1455 = vst [vmem:[#allocation9 + $0xe8] sm:$0xff] %v1407_v1  ;;  %1456 = vst [vmem:[#allocation9 + $0xf0] sm:$0xff] %v1408_v49 }
 0x451   : > { %1457 = vst [vmem:[#allocation9 + $0xf8] sm:$0xff] %v1409_v33  ;;  %1458 = vst [vmem:[#allocation9 + $0x100] sm:$0xff] %v1410_v37 }
 0x452   : > { %1459 = vst [vmem:[#allocation9 + $0x108] sm:$0xff] %v1411_v54  ;;  %1460 = vst [vmem:[#allocation9 + $0x110] sm:$0xff] %v1412_v52 }
 0x453   : > { %1461 = vst [vmem:[#allocation9 + $0x118] sm:$0xff] %v1413_v24  ;;  %1462 = vst [vmem:[#allocation9 + $0x120] sm:$0xff] %v1414_v41 }
 0x454   : > { %1463 = vst [vmem:[#allocation9 + $0x128] sm:$0xff] %v1415_v19  ;;  %1464 = vst [vmem:[#allocation9 + $0x130] sm:$0xff] %v1416_v38 }
 0x455   : > { %1465 = vst [vmem:[#allocation9 + $0x138] sm:$0xff] %v1417_v59  ;;  %1466 = vst [vmem:[#allocation9 + $0x140] sm:$0xff] %v1418_v45 }
 0x456   : > { %1467 = vst [vmem:[#allocation9 + $0x148] sm:$0xff] %v1419_v23  ;;  %1468 = vst [vmem:[#allocation9 + $0x150] sm:$0xff] %v1420_v18 }
 0x457   : > { %1469 = vst [vmem:[#allocation9 + $0x158] sm:$0xff] %v1421_v28  ;;  %1470 = vst [vmem:[#allocation9 + $0x160] sm:$0xff] %v1422_v30 }
 0x458   : > { %1471 = vst [vmem:[#allocation9 + $0x168] sm:$0xff] %v1423_v4  ;;  %1472 = vst [vmem:[#allocation9 + $0x170] sm:$0xff] %v1424_v34 }
 0x459   : > { %1473 = vst [vmem:[#allocation9 + $0x178] sm:$0xff] %v1425_v36 }
 0x45a PF: > { %p1608_p3 = scmp.eq.s32.totalorder %s1942_s16, 2  ;;  %s1900_s10 = smov [#allocation9]  }
 0x45b   : > { %s1480_s27 = sshll.u32 %s1900_s10, 4  ;;  %s1481_s27 = int_to_ptr.vmem [resolvable:$true] %s1480_s27 }
 0x45c   : > { %s1816_s11 = scalar_lea.vmem %s1481_s27, 6144  ;;  %p1823_p13 = scmp.lt.s32.totalorder %s1481_s27, %s1481_s27 }
 0x45d   : > { %p1817_p6 = scmp.ne.s32.totalorder %s1481_s27, %s1816_s11  ;;  %p1824_p12 = scmp.lt.s32.totalorder %s1816_s11, %s1816_s11 }
 0x45f   : > { %p1818_p7 = pnand %p1817_p6, %p1608_p3  ;;  %p1825_p0 = por %p1824_p12, %p1823_p13 }
 0x461   : > { %p1819_p11 = pneg %p1818_p7 }
 0x463   : > { %p1826_p5 = pnand %p1825_p0, %p1819_p11 }
 0x465   : > { %1829 = shalt.err (!%p1826_p5)
}
 0x466   : > { %s1830_s19 = scalar_lea.hbm %s2978_s3, 6144 }
 0x467   : > { %p1831_p8 = scmp.ne.s32.totalorder %s2978_s3, %s1830_s19  ;;  %p1836_p10 = scmp.lt.u32.totalorder %s1830_s19, %s2978_s3 }
 0x469   : > { %p1832_p4 = pnand %p1831_p8, %p1608_p3 }
 0x46b   : > { %p1833_p9 = pneg %p1832_p4 }
 0x46d   : > { %p1838_p1 = pnand %p1836_p10, %p1833_p9 }
 0x46f   : > { %1841 = shalt.err (!%p1838_p1)
}
 0x470   : > { %s1901_s30 = smov 128   ;;  %s1902_s25 = smov 8  }
 0x471   : > { %1594 = dma.vmem_to_hbm [thread:$0]  (%p1608_p3), %s1481_s27, 6144, %s2978_s3, [#allocation5], %s1901_s30, %s1901_s30, %s1902_s25  }
 0x472   : > { %1871 = dma.done.wait (%p1608_p3), [#allocation5], 6144  }
 0x473   : > { %1873 = vsyncadd (%p1608_p3), [#allocation5], 4294961152 }
 0x474 PF: > { %p13_p2 = scmp.ge.s32.totalorder %s1945_s17, 5   ;;  %s3166_s12 = smov %s1880_s13 }
 0x475   : > { %s3167_s13 = smov %s1884_s14  ;;  %s3168_s14 = smov %s1955_s20 }
 0x476   : > { %s3169_s15 = smov %s1945_s17  ;;  %15 = sbr.rel (!%p13_p2) target bundleno = 4 (0x4), region = 90 }
 0x47d   :  { %1496 = vsyncpa [#allocation4], 1 }
 0x47e   :  { %1498 = vsyncpa [#allocation4 + $0x1], 1 }
 0x47f   :  { %1499 = vsyncpa [#allocation7], 1 }
 0x480   :  { %1500 = vsyncpa [#allocation5], 1 }
 0x481   :  { %1502 = vsyncpa [#allocation5 + $0x1], 1 }

</bundles_post_ra>
